<compile_context>
chip_gen: v6e
topology: v6e:2x2x1
jax: 0.10.0
libtpu: 0.0.40
codegen_flags: <defaults>
</compile_context>

<pallas_src>
import functools

import jax
import jax.numpy as jnp
import numpy as np
from jax import lax
from jax.experimental import pallas as pl
from jax.experimental.pallas import tpu as pltpu

NEG_SLOPE = 0.01  # PyTorch nn.LeakyReLU default negative_slope


def _conv3x3_flat(inp, col_ref, mask_ref, w_ref, b_ref, *, H, W, C):
    """3x3 'same' conv on a (C, H*W) f32 activation (spatial flattened on lanes).

    Each tap (dy, dx) is a static lane roll of the flat spatial axis; wrap-around
    (out-of-image) contributions are zeroed with a precomputed 0/1 mask via one
    sublane-broadcast multiply. Taps are staged bf16 into the (9*C, H*W) col
    scratch with aligned full-lane stores, then a single deep MXU matmul
    (K = 9*C) against fused (C, 9*C) bf16 weights accumulates in f32.
    Returns (C, H*W) f32 with the bias added.
    """
    HW = H * W
    for t in range(9):
        dy, dx = t // 3 - 1, t % 3 - 1
        shift = dy * W + dx
        tap = inp if shift == 0 else pltpu.roll(inp, shift=(-shift) % HW, axis=1)
        if not (dy == 0 and dx == 0):
            tap = tap * mask_ref[t]                    # (1, HW) 0/1 edge mask
        col_ref[t * C:(t + 1) * C, :] = tap.astype(jnp.bfloat16)
    acc = jnp.dot(w_ref[...], col_ref[...], preferred_element_type=jnp.float32)
    return acc + b_ref[...]                            # (C, H*W) f32


def resblock_kernel(x_ref, mask_ref, w1_ref, b1_ref, w2_ref, b2_ref, out_ref,
                    col_ref, *, H, W, C):
    # x_ref   : (C, H*W)          one NCHW image, spatial flattened on lanes
    # mask_ref: (9, 1, H*W) f32   per-tap 0/1 validity masks ('same' zero padding)
    # w*_ref  : (C, 9*C)   bf16   fused im2col conv weights (Cout, 9*Cin)
    # b*_ref  : (C, 1)     f32
    # out_ref : (C, H*W)          output image (aliases the input buffer in HBM)
    # col_ref : (9*C, H*W) bf16   im2col patches scratch (reused by both convs)
    x = x_ref[...].astype(jnp.float32)

    # conv1 -> LeakyReLU
    h = _conv3x3_flat(x, col_ref, mask_ref, w1_ref, b1_ref, H=H, W=W, C=C)
    h = jnp.where(h > 0, h, NEG_SLOPE * h)

    # conv2 + residual (residual read straight from the input block, f32)
    y = _conv3x3_flat(h, col_ref, mask_ref, w2_ref, b2_ref, H=H, W=W, C=C)
    out_ref[...] = (y + x).astype(out_ref.dtype)


@jax.jit
def resblock_forward(x_nchw, w1, b1, w2, b2):
    """x_nchw: (N, C, H, W); w*: PyTorch OIHW (Cout, Cin, 3, 3); b*: (Cout,)."""
    N, Cin, H, W = x_nchw.shape
    Cout = w1.shape[0]
    assert Cin == Cout, "ResBlock residual add requires in_channels == out_channels"
    C, HW = Cin, H * W

    # NCHW kept end-to-end; only a free collapse of the two contiguous minor dims.
    x = x_nchw.reshape(N, C, HW)

    # OIHW (Cout, Cin, 3, 3) -> (Cout, ky, kx, Cin) -> fused im2col (Cout, 9*Cin),
    # bf16 for the MXU (accumulation stays f32 in-kernel).
    w1k = jnp.transpose(w1, (0, 2, 3, 1)).reshape(C, 9 * C).astype(jnp.bfloat16)
    w2k = jnp.transpose(w2, (0, 2, 3, 1)).reshape(C, 9 * C).astype(jnp.bfloat16)
    b1k = b1.reshape(C, 1).astype(jnp.float32)
    b2k = b2.reshape(C, 1).astype(jnp.float32)

    # Per-tap 0/1 validity masks for 'same' zero padding, tap order
    # t = (dy+1)*3 + (dx+1), matching the fused-weight (ky, kx) ordering above.
    ys, xs = np.mgrid[0:H, 0:W]
    mask_np = np.stack([
        ((ys + dy >= 0) & (ys + dy < H) & (xs + dx >= 0) & (xs + dx < W))
        .reshape(HW)
        for dy in (-1, 0, 1) for dx in (-1, 0, 1)
    ]).astype(np.float32).reshape(9, 1, HW)
    mask = jnp.asarray(mask_np)

    kernel = functools.partial(resblock_kernel, H=H, W=W, C=C)

    itemsize = x_nchw.dtype.itemsize
    flops = 2 * (2 * N * HW * C * 9 * C)               # two 3x3 convs
    bytes_accessed = (2 * N * C * HW * itemsize        # x read + out write
                      + 9 * HW * 4                      # masks
                      + 2 * (9 * C * C * 2 + C * 4))    # weights + biases

    out = pl.pallas_call(
        kernel,
        out_shape=jax.ShapeDtypeStruct((N, C, HW), x_nchw.dtype),
        grid_spec=pltpu.PrefetchScalarGridSpec(
            num_scalar_prefetch=0,
            grid=(N,),  # one grid step per image
            # TODO(synk): for large H*W add a row-strip grid axis (2-row input
            # halo for the two stacked 3x3 convs) so each core gets >=8 pipeline
            # steps and the col scratch stays inside v7x's 64 MiB VMEM; on v7x
            # the single K=9C matmul can also become 3 accumulating K=3C matmuls
            # (MRB in-place accumulate) to drop the col staging entirely.
            in_specs=[
                pl.BlockSpec((None, C, HW), lambda n: (n, 0, 0)),
                pl.BlockSpec((9, 1, HW), lambda n: (0, 0, 0)),
                pl.BlockSpec((C, 9 * C), lambda n: (0, 0)),
                pl.BlockSpec((C, 1), lambda n: (0, 0)),
                pl.BlockSpec((C, 9 * C), lambda n: (0, 0)),
                pl.BlockSpec((C, 1), lambda n: (0, 0)),
            ],
            out_specs=pl.BlockSpec((None, C, HW), lambda n: (n, 0, 0)),
            scratch_shapes=[
                pltpu.VMEM((9 * C, HW), jnp.bfloat16),   # im2col patches
            ],
        ),
        compiler_params=pltpu.CompilerParams(
            dimension_semantics=("parallel",)),
        # Output has x's shape/dtype and every grid step reads block n before
        # writing it -> safe to alias; saves the extra HBM output allocation.
        input_output_aliases={0: 0},
        cost_estimate=pl.CostEstimate(flops=flops, transcendentals=0,
                                      bytes_accessed=bytes_accessed),
    )(x, mask, w1k, b1k, w2k, b2k)

    return out.reshape(N, C, H, W)                     # free minor-dim expand


if __name__ == "__main__":
    # Shapes consistent with ResBlock defaults (in=out=32 channels).
    N, Cin, Cout, H, W = 2, 32, 32, 16, 16

    key = jax.random.PRNGKey(0)
    k0, k1, k2, k3, k4 = jax.random.split(key, 5)
    x = jax.random.normal(k0, (N, Cin, H, W), jnp.float32)

    # Deterministic parameter init (PyTorch-style uniform bounds; synthetic weights).
    bound1 = 1.0 / float(np.sqrt(Cin * 9))
    bound2 = 1.0 / float(np.sqrt(Cout * 9))
    w1 = jax.random.uniform(k1, (Cout, Cin, 3, 3), jnp.float32, -bound1, bound1)
    b1 = jax.random.uniform(k2, (Cout,), jnp.float32, -bound1, bound1)
    w2 = jax.random.uniform(k3, (Cout, Cout, 3, 3), jnp.float32, -bound2, bound2)
    b2 = jax.random.uniform(k4, (Cout,), jnp.float32, -bound2, bound2)

    out = jax.block_until_ready(resblock_forward(x, w1, b1, w2, b2))

    # Pure-JAX f32 reference of the module's forward semantics.
    def conv(z, w, b):
        y = lax.conv_general_dilated(z, w, (1, 1), 'SAME',
                                     dimension_numbers=('NCHW', 'OIHW', 'NCHW'))
        return y + b[None, :, None, None]

    hidden = conv(x, w1, b1)
    hidden = jnp.where(hidden > 0, hidden, NEG_SLOPE * hidden)
    ref = conv(hidden, w2, b2) + x

    assert out.shape == (N, Cin, H, W)
    # bf16 matmul operands with f32 accumulation -> slightly looser tolerance than f32.
    # TODO(synk): keep activations f32 (bf16x3 matmul) if bit-parity with the f32
    # PyTorch module is required; MXU is nearly idle at these shapes so it is cheap.
    assert jnp.allclose(out, ref, atol=5e-2, rtol=5e-2), "mismatch vs JAX reference"

    print("KERNEL_OK")
</pallas_src>

<mosaic_0001>
module attributes {stable_mosaic.version = 11 : i64} {
  func.func @resblock_kernel(%arg0: i32, %arg1: memref<1x32x256xf32, #tpu.memory_space<vmem>>, %arg2: memref<9x1x256xf32, #tpu.memory_space<vmem>>, %arg3: memref<32x288xbf16, #tpu.memory_space<vmem>>, %arg4: memref<32x1xf32, #tpu.memory_space<vmem>>, %arg5: memref<32x288xbf16, #tpu.memory_space<vmem>>, %arg6: memref<32x1xf32, #tpu.memory_space<vmem>>, %arg7: memref<1x32x256xf32, #tpu.memory_space<vmem>>, %arg8: memref<288x256xbf16, #tpu.memory_space<vmem>>) attributes {dimension_semantics = [#tpu.dimension_semantics<parallel>], iteration_bounds = array<i64: 2>, scalar_prefetch = 0 : i64, scratch_operands = 1 : i64, tpu.core_type = #tpu.core_type<tc>, window_params = [{transform_indices = @transform_0, window_bounds = array<i64: 1, 32, 256>}, {pipeline_mode = #tpu.pipeline_mode<synchronous>, transform_indices = @transform_1, window_bounds = array<i64: 9, 1, 256>}, {pipeline_mode = #tpu.pipeline_mode<synchronous>, transform_indices = @transform_2, window_bounds = array<i64: 32, 288>}, {pipeline_mode = #tpu.pipeline_mode<synchronous>, transform_indices = @transform_3, window_bounds = array<i64: 32, 1>}, {pipeline_mode = #tpu.pipeline_mode<synchronous>, transform_indices = @transform_4, window_bounds = array<i64: 32, 288>}, {pipeline_mode = #tpu.pipeline_mode<synchronous>, transform_indices = @transform_5, window_bounds = array<i64: 32, 1>}, {transform_indices = @transform_6, window_bounds = array<i64: 1, 32, 256>}]} {
    %c0 = arith.constant 0 : index
    %c0_0 = arith.constant 0 : index
    %c0_1 = arith.constant 0 : index
    %0 = vector.load %arg1[%c0, %c0_0, %c0_1] : memref<1x32x256xf32, #tpu.memory_space<vmem>>, vector<1x32x256xf32>
    %1 = vector.shape_cast %0 : vector<1x32x256xf32> to vector<32x256xf32>
    %c17_i32 = arith.constant 17 : i32
    %2 = tpu.dynamic_rotate %1 by %c17_i32 dim 1 : vector<32x256xf32>, i32 -> vector<32x256xf32>
    %c0_2 = arith.constant 0 : index
    %c0_3 = arith.constant 0 : index
    %c0_4 = arith.constant 0 : index
    %3 = vector.load %arg2[%c0_2, %c0_3, %c0_4] : memref<9x1x256xf32, #tpu.memory_space<vmem>>, vector<1x1x256xf32>
    %4 = vector.shape_cast %3 : vector<1x1x256xf32> to vector<1x256xf32>
    %5 = vector.broadcast %4 : vector<1x256xf32> to vector<32x256xf32>
    %6 = arith.mulf %2, %5 : vector<32x256xf32>
    %7 = arith.truncf %6 : vector<32x256xf32> to vector<32x256xbf16>
    %c0_5 = arith.constant 0 : index
    %c0_6 = arith.constant 0 : index
    %8 = vector.load %arg8[%c0_5, %c0_6] : memref<288x256xbf16, #tpu.memory_space<vmem>>, vector<32x256xbf16>
    tpu.vector_store %arg8[%c0_5, %c0_6], %7 {strides = array<i32>} : memref<288x256xbf16, #tpu.memory_space<vmem>>, vector<32x256xbf16>,
    %c16_i32 = arith.constant 16 : i32
    %9 = tpu.dynamic_rotate %1 by %c16_i32 dim 1 : vector<32x256xf32>, i32 -> vector<32x256xf32>
    %c1 = arith.constant 1 : index
    %c0_7 = arith.constant 0 : index
    %c0_8 = arith.constant 0 : index
    %10 = vector.load %arg2[%c1, %c0_7, %c0_8] : memref<9x1x256xf32, #tpu.memory_space<vmem>>, vector<1x1x256xf32>
    %11 = vector.shape_cast %10 : vector<1x1x256xf32> to vector<1x256xf32>
    %12 = vector.broadcast %11 : vector<1x256xf32> to vector<32x256xf32>
    %13 = arith.mulf %9, %12 : vector<32x256xf32>
    %14 = arith.truncf %13 : vector<32x256xf32> to vector<32x256xbf16>
    %c32 = arith.constant 32 : index
    %c0_9 = arith.constant 0 : index
    %15 = vector.load %arg8[%c32, %c0_9] : memref<288x256xbf16, #tpu.memory_space<vmem>>, vector<32x256xbf16>
    tpu.vector_store %arg8[%c32, %c0_9], %14 {strides = array<i32>} : memref<288x256xbf16, #tpu.memory_space<vmem>>, vector<32x256xbf16>,
    %c15_i32 = arith.constant 15 : i32
    %16 = tpu.dynamic_rotate %1 by %c15_i32 dim 1 : vector<32x256xf32>, i32 -> vector<32x256xf32>
    %c2 = arith.constant 2 : index
    %c0_10 = arith.constant 0 : index
    %c0_11 = arith.constant 0 : index
    %17 = vector.load %arg2[%c2, %c0_10, %c0_11] : memref<9x1x256xf32, #tpu.memory_space<vmem>>, vector<1x1x256xf32>
    %18 = vector.shape_cast %17 : vector<1x1x256xf32> to vector<1x256xf32>
    %19 = vector.broadcast %18 : vector<1x256xf32> to vector<32x256xf32>
    %20 = arith.mulf %16, %19 : vector<32x256xf32>
    %21 = arith.truncf %20 : vector<32x256xf32> to vector<32x256xbf16>
    %c64 = arith.constant 64 : index
    %c0_12 = arith.constant 0 : index
    %22 = vector.load %arg8[%c64, %c0_12] : memref<288x256xbf16, #tpu.memory_space<vmem>>, vector<32x256xbf16>
    tpu.vector_store %arg8[%c64, %c0_12], %21 {strides = array<i32>} : memref<288x256xbf16, #tpu.memory_space<vmem>>, vector<32x256xbf16>,
    %c1_i32 = arith.constant 1 : i32
    %23 = tpu.dynamic_rotate %1 by %c1_i32 dim 1 : vector<32x256xf32>, i32 -> vector<32x256xf32>
    %c3 = arith.constant 3 : index
    %c0_13 = arith.constant 0 : index
    %c0_14 = arith.constant 0 : index
    %24 = vector.load %arg2[%c3, %c0_13, %c0_14] : memref<9x1x256xf32, #tpu.memory_space<vmem>>, vector<1x1x256xf32>
    %25 = vector.shape_cast %24 : vector<1x1x256xf32> to vector<1x256xf32>
    %26 = vector.broadcast %25 : vector<1x256xf32> to vector<32x256xf32>
    %27 = arith.mulf %23, %26 : vector<32x256xf32>
    %28 = arith.truncf %27 : vector<32x256xf32> to vector<32x256xbf16>
    %c96 = arith.constant 96 : index
    %c0_15 = arith.constant 0 : index
    %29 = vector.load %arg8[%c96, %c0_15] : memref<288x256xbf16, #tpu.memory_space<vmem>>, vector<32x256xbf16>
    tpu.vector_store %arg8[%c96, %c0_15], %28 {strides = array<i32>} : memref<288x256xbf16, #tpu.memory_space<vmem>>, vector<32x256xbf16>,
    %30 = arith.truncf %1 : vector<32x256xf32> to vector<32x256xbf16>
    %c128 = arith.constant 128 : index
    %c0_16 = arith.constant 0 : index
    %31 = vector.load %arg8[%c128, %c0_16] : memref<288x256xbf16, #tpu.memory_space<vmem>>, vector<32x256xbf16>
    tpu.vector_store %arg8[%c128, %c0_16], %30 {strides = array<i32>} : memref<288x256xbf16, #tpu.memory_space<vmem>>, vector<32x256xbf16>,
    %c255_i32 = arith.constant 255 : i32
    %32 = tpu.dynamic_rotate %1 by %c255_i32 dim 1 : vector<32x256xf32>, i32 -> vector<32x256xf32>
    %c5 = arith.constant 5 : index
    %c0_17 = arith.constant 0 : index
    %c0_18 = arith.constant 0 : index
    %33 = vector.load %arg2[%c5, %c0_17, %c0_18] : memref<9x1x256xf32, #tpu.memory_space<vmem>>, vector<1x1x256xf32>
    %34 = vector.shape_cast %33 : vector<1x1x256xf32> to vector<1x256xf32>
    %35 = vector.broadcast %34 : vector<1x256xf32> to vector<32x256xf32>
    %36 = arith.mulf %32, %35 : vector<32x256xf32>
    %37 = arith.truncf %36 : vector<32x256xf32> to vector<32x256xbf16>
    %c160 = arith.constant 160 : index
    %c0_19 = arith.constant 0 : index
    %38 = vector.load %arg8[%c160, %c0_19] : memref<288x256xbf16, #tpu.memory_space<vmem>>, vector<32x256xbf16>
    tpu.vector_store %arg8[%c160, %c0_19], %37 {strides = array<i32>} : memref<288x256xbf16, #tpu.memory_space<vmem>>, vector<32x256xbf16>,
    %c241_i32 = arith.constant 241 : i32
    %39 = tpu.dynamic_rotate %1 by %c241_i32 dim 1 : vector<32x256xf32>, i32 -> vector<32x256xf32>
    %c6 = arith.constant 6 : index
    %c0_20 = arith.constant 0 : index
    %c0_21 = arith.constant 0 : index
    %40 = vector.load %arg2[%c6, %c0_20, %c0_21] : memref<9x1x256xf32, #tpu.memory_space<vmem>>, vector<1x1x256xf32>
    %41 = vector.shape_cast %40 : vector<1x1x256xf32> to vector<1x256xf32>
    %42 = vector.broadcast %41 : vector<1x256xf32> to vector<32x256xf32>
    %43 = arith.mulf %39, %42 : vector<32x256xf32>
    %44 = arith.truncf %43 : vector<32x256xf32> to vector<32x256xbf16>
    %c192 = arith.constant 192 : index
    %c0_22 = arith.constant 0 : index
    %45 = vector.load %arg8[%c192, %c0_22] : memref<288x256xbf16, #tpu.memory_space<vmem>>, vector<32x256xbf16>
    tpu.vector_store %arg8[%c192, %c0_22], %44 {strides = array<i32>} : memref<288x256xbf16, #tpu.memory_space<vmem>>, vector<32x256xbf16>,
    %c240_i32 = arith.constant 240 : i32
    %46 = tpu.dynamic_rotate %1 by %c240_i32 dim 1 : vector<32x256xf32>, i32 -> vector<32x256xf32>
    %c7 = arith.constant 7 : index
    %c0_23 = arith.constant 0 : index
    %c0_24 = arith.constant 0 : index
    %47 = vector.load %arg2[%c7, %c0_23, %c0_24] : memref<9x1x256xf32, #tpu.memory_space<vmem>>, vector<1x1x256xf32>
    %48 = vector.shape_cast %47 : vector<1x1x256xf32> to vector<1x256xf32>
    %49 = vector.broadcast %48 : vector<1x256xf32> to vector<32x256xf32>
    %50 = arith.mulf %46, %49 : vector<32x256xf32>
    %51 = arith.truncf %50 : vector<32x256xf32> to vector<32x256xbf16>
    %c224 = arith.constant 224 : index
    %c0_25 = arith.constant 0 : index
    %52 = vector.load %arg8[%c224, %c0_25] : memref<288x256xbf16, #tpu.memory_space<vmem>>, vector<32x256xbf16>
    tpu.vector_store %arg8[%c224, %c0_25], %51 {strides = array<i32>} : memref<288x256xbf16, #tpu.memory_space<vmem>>, vector<32x256xbf16>,
    %c239_i32 = arith.constant 239 : i32
    %53 = tpu.dynamic_rotate %1 by %c239_i32 dim 1 : vector<32x256xf32>, i32 -> vector<32x256xf32>
    %c8 = arith.constant 8 : index
    %c0_26 = arith.constant 0 : index
    %c0_27 = arith.constant 0 : index
    %54 = vector.load %arg2[%c8, %c0_26, %c0_27] : memref<9x1x256xf32, #tpu.memory_space<vmem>>, vector<1x1x256xf32>
    %55 = vector.shape_cast %54 : vector<1x1x256xf32> to vector<1x256xf32>
    %56 = vector.broadcast %55 : vector<1x256xf32> to vector<32x256xf32>
    %57 = arith.mulf %53, %56 : vector<32x256xf32>
    %58 = arith.truncf %57 : vector<32x256xf32> to vector<32x256xbf16>
    %c256 = arith.constant 256 : index
    %c0_28 = arith.constant 0 : index
    %59 = vector.load %arg8[%c256, %c0_28] : memref<288x256xbf16, #tpu.memory_space<vmem>>, vector<32x256xbf16>
    tpu.vector_store %arg8[%c256, %c0_28], %58 {strides = array<i32>} : memref<288x256xbf16, #tpu.memory_space<vmem>>, vector<32x256xbf16>,
    %c0_29 = arith.constant 0 : index
    %c0_30 = arith.constant 0 : index
    %60 = vector.load %arg3[%c0_29, %c0_30] : memref<32x288xbf16, #tpu.memory_space<vmem>>, vector<32x288xbf16>
    %c0_31 = arith.constant 0 : index
    %c0_32 = arith.constant 0 : index
    %61 = vector.load %arg8[%c0_31, %c0_32] : memref<288x256xbf16, #tpu.memory_space<vmem>>, vector<288x256xbf16>
    %cst = arith.constant dense<0.000000e+00> : vector<32x256xf32>
    %62 = tpu.matmul %60, %61, %cst {dimension_numbers = #tpu.dot_dimension_numbers<[1], [0], [0], [1], [0, 0, 1, 1], [], []>} : vector<32x288xbf16>, vector<288x256xbf16>, vector<32x256xf32> -> vector<32x256xf32>
    %c0_33 = arith.constant 0 : index
    %c0_34 = arith.constant 0 : index
    %63 = vector.load %arg4[%c0_33, %c0_34] : memref<32x1xf32, #tpu.memory_space<vmem>>, vector<32x1xf32>
    %64 = vector.broadcast %63 : vector<32x1xf32> to vector<32x256xf32>
    %65 = arith.addf %62, %64 : vector<32x256xf32>
    %cst_35 = arith.constant 0.000000e+00 : f32
    %66 = vector.broadcast %cst_35 : f32 to vector<32x256xf32>
    %67 = arith.cmpf ogt, %65, %66 : vector<32x256xf32>
    %cst_36 = arith.constant 0.00999999977 : f32
    %68 = vector.broadcast %cst_36 : f32 to vector<32x256xf32>
    %69 = arith.mulf %68, %65 : vector<32x256xf32>
    %70 = arith.select %67, %65, %69 : vector<32x256xi1>, vector<32x256xf32>
    %c17_i32_37 = arith.constant 17 : i32
    %71 = tpu.dynamic_rotate %70 by %c17_i32_37 dim 1 : vector<32x256xf32>, i32 -> vector<32x256xf32>
    %c0_38 = arith.constant 0 : index
    %c0_39 = arith.constant 0 : index
    %c0_40 = arith.constant 0 : index
    %72 = vector.load %arg2[%c0_38, %c0_39, %c0_40] : memref<9x1x256xf32, #tpu.memory_space<vmem>>, vector<1x1x256xf32>
    %73 = vector.shape_cast %72 : vector<1x1x256xf32> to vector<1x256xf32>
    %74 = vector.broadcast %73 : vector<1x256xf32> to vector<32x256xf32>
    %75 = arith.mulf %71, %74 : vector<32x256xf32>
    %76 = arith.truncf %75 : vector<32x256xf32> to vector<32x256xbf16>
    %c0_41 = arith.constant 0 : index
    %c0_42 = arith.constant 0 : index
    %77 = vector.load %arg8[%c0_41, %c0_42] : memref<288x256xbf16, #tpu.memory_space<vmem>>, vector<32x256xbf16>
    tpu.vector_store %arg8[%c0_41, %c0_42], %76 {strides = array<i32>} : memref<288x256xbf16, #tpu.memory_space<vmem>>, vector<32x256xbf16>,
    %c16_i32_43 = arith.constant 16 : i32
    %78 = tpu.dynamic_rotate %70 by %c16_i32_43 dim 1 : vector<32x256xf32>, i32 -> vector<32x256xf32>
    %c1_44 = arith.constant 1 : index
    %c0_45 = arith.constant 0 : index
    %c0_46 = arith.constant 0 : index
    %79 = vector.load %arg2[%c1_44, %c0_45, %c0_46] : memref<9x1x256xf32, #tpu.memory_space<vmem>>, vector<1x1x256xf32>
    %80 = vector.shape_cast %79 : vector<1x1x256xf32> to vector<1x256xf32>
    %81 = vector.broadcast %80 : vector<1x256xf32> to vector<32x256xf32>
    %82 = arith.mulf %78, %81 : vector<32x256xf32>
    %83 = arith.truncf %82 : vector<32x256xf32> to vector<32x256xbf16>
    %c32_47 = arith.constant 32 : index
    %c0_48 = arith.constant 0 : index
    %84 = vector.load %arg8[%c32_47, %c0_48] : memref<288x256xbf16, #tpu.memory_space<vmem>>, vector<32x256xbf16>
    tpu.vector_store %arg8[%c32_47, %c0_48], %83 {strides = array<i32>} : memref<288x256xbf16, #tpu.memory_space<vmem>>, vector<32x256xbf16>,
    %c15_i32_49 = arith.constant 15 : i32
    %85 = tpu.dynamic_rotate %70 by %c15_i32_49 dim 1 : vector<32x256xf32>, i32 -> vector<32x256xf32>
    %c2_50 = arith.constant 2 : index
    %c0_51 = arith.constant 0 : index
    %c0_52 = arith.constant 0 : index
    %86 = vector.load %arg2[%c2_50, %c0_51, %c0_52] : memref<9x1x256xf32, #tpu.memory_space<vmem>>, vector<1x1x256xf32>
    %87 = vector.shape_cast %86 : vector<1x1x256xf32> to vector<1x256xf32>
    %88 = vector.broadcast %87 : vector<1x256xf32> to vector<32x256xf32>
    %89 = arith.mulf %85, %88 : vector<32x256xf32>
    %90 = arith.truncf %89 : vector<32x256xf32> to vector<32x256xbf16>
    %c64_53 = arith.constant 64 : index
    %c0_54 = arith.constant 0 : index
    %91 = vector.load %arg8[%c64_53, %c0_54] : memref<288x256xbf16, #tpu.memory_space<vmem>>, vector<32x256xbf16>
    tpu.vector_store %arg8[%c64_53, %c0_54], %90 {strides = array<i32>} : memref<288x256xbf16, #tpu.memory_space<vmem>>, vector<32x256xbf16>,
    %c1_i32_55 = arith.constant 1 : i32
    %92 = tpu.dynamic_rotate %70 by %c1_i32_55 dim 1 : vector<32x256xf32>, i32 -> vector<32x256xf32>
    %c3_56 = arith.constant 3 : index
    %c0_57 = arith.constant 0 : index
    %c0_58 = arith.constant 0 : index
    %93 = vector.load %arg2[%c3_56, %c0_57, %c0_58] : memref<9x1x256xf32, #tpu.memory_space<vmem>>, vector<1x1x256xf32>
    %94 = vector.shape_cast %93 : vector<1x1x256xf32> to vector<1x256xf32>
    %95 = vector.broadcast %94 : vector<1x256xf32> to vector<32x256xf32>
    %96 = arith.mulf %92, %95 : vector<32x256xf32>
    %97 = arith.truncf %96 : vector<32x256xf32> to vector<32x256xbf16>
    %c96_59 = arith.constant 96 : index
    %c0_60 = arith.constant 0 : index
    %98 = vector.load %arg8[%c96_59, %c0_60] : memref<288x256xbf16, #tpu.memory_space<vmem>>, vector<32x256xbf16>
    tpu.vector_store %arg8[%c96_59, %c0_60], %97 {strides = array<i32>} : memref<288x256xbf16, #tpu.memory_space<vmem>>, vector<32x256xbf16>,
    %99 = arith.truncf %70 : vector<32x256xf32> to vector<32x256xbf16>
    %c128_61 = arith.constant 128 : index
    %c0_62 = arith.constant 0 : index
    %100 = vector.load %arg8[%c128_61, %c0_62] : memref<288x256xbf16, #tpu.memory_space<vmem>>, vector<32x256xbf16>
    tpu.vector_store %arg8[%c128_61, %c0_62], %99 {strides = array<i32>} : memref<288x256xbf16, #tpu.memory_space<vmem>>, vector<32x256xbf16>,
    %c255_i32_63 = arith.constant 255 : i32
    %101 = tpu.dynamic_rotate %70 by %c255_i32_63 dim 1 : vector<32x256xf32>, i32 -> vector<32x256xf32>
    %c5_64 = arith.constant 5 : index
    %c0_65 = arith.constant 0 : index
    %c0_66 = arith.constant 0 : index
    %102 = vector.load %arg2[%c5_64, %c0_65, %c0_66] : memref<9x1x256xf32, #tpu.memory_space<vmem>>, vector<1x1x256xf32>
    %103 = vector.shape_cast %102 : vector<1x1x256xf32> to vector<1x256xf32>
    %104 = vector.broadcast %103 : vector<1x256xf32> to vector<32x256xf32>
    %105 = arith.mulf %101, %104 : vector<32x256xf32>
    %106 = arith.truncf %105 : vector<32x256xf32> to vector<32x256xbf16>
    %c160_67 = arith.constant 160 : index
    %c0_68 = arith.constant 0 : index
    %107 = vector.load %arg8[%c160_67, %c0_68] : memref<288x256xbf16, #tpu.memory_space<vmem>>, vector<32x256xbf16>
    tpu.vector_store %arg8[%c160_67, %c0_68], %106 {strides = array<i32>} : memref<288x256xbf16, #tpu.memory_space<vmem>>, vector<32x256xbf16>,
    %c241_i32_69 = arith.constant 241 : i32
    %108 = tpu.dynamic_rotate %70 by %c241_i32_69 dim 1 : vector<32x256xf32>, i32 -> vector<32x256xf32>
    %c6_70 = arith.constant 6 : index
    %c0_71 = arith.constant 0 : index
    %c0_72 = arith.constant 0 : index
    %109 = vector.load %arg2[%c6_70, %c0_71, %c0_72] : memref<9x1x256xf32, #tpu.memory_space<vmem>>, vector<1x1x256xf32>
    %110 = vector.shape_cast %109 : vector<1x1x256xf32> to vector<1x256xf32>
    %111 = vector.broadcast %110 : vector<1x256xf32> to vector<32x256xf32>
    %112 = arith.mulf %108, %111 : vector<32x256xf32>
    %113 = arith.truncf %112 : vector<32x256xf32> to vector<32x256xbf16>
    %c192_73 = arith.constant 192 : index
    %c0_74 = arith.constant 0 : index
    %114 = vector.load %arg8[%c192_73, %c0_74] : memref<288x256xbf16, #tpu.memory_space<vmem>>, vector<32x256xbf16>
    tpu.vector_store %arg8[%c192_73, %c0_74], %113 {strides = array<i32>} : memref<288x256xbf16, #tpu.memory_space<vmem>>, vector<32x256xbf16>,
    %c240_i32_75 = arith.constant 240 : i32
    %115 = tpu.dynamic_rotate %70 by %c240_i32_75 dim 1 : vector<32x256xf32>, i32 -> vector<32x256xf32>
    %c7_76 = arith.constant 7 : index
    %c0_77 = arith.constant 0 : index
    %c0_78 = arith.constant 0 : index
    %116 = vector.load %arg2[%c7_76, %c0_77, %c0_78] : memref<9x1x256xf32, #tpu.memory_space<vmem>>, vector<1x1x256xf32>
    %117 = vector.shape_cast %116 : vector<1x1x256xf32> to vector<1x256xf32>
    %118 = vector.broadcast %117 : vector<1x256xf32> to vector<32x256xf32>
    %119 = arith.mulf %115, %118 : vector<32x256xf32>
    %120 = arith.truncf %119 : vector<32x256xf32> to vector<32x256xbf16>
    %c224_79 = arith.constant 224 : index
    %c0_80 = arith.constant 0 : index
    %121 = vector.load %arg8[%c224_79, %c0_80] : memref<288x256xbf16, #tpu.memory_space<vmem>>, vector<32x256xbf16>
    tpu.vector_store %arg8[%c224_79, %c0_80], %120 {strides = array<i32>} : memref<288x256xbf16, #tpu.memory_space<vmem>>, vector<32x256xbf16>,
    %c239_i32_81 = arith.constant 239 : i32
    %122 = tpu.dynamic_rotate %70 by %c239_i32_81 dim 1 : vector<32x256xf32>, i32 -> vector<32x256xf32>
    %c8_82 = arith.constant 8 : index
    %c0_83 = arith.constant 0 : index
    %c0_84 = arith.constant 0 : index
    %123 = vector.load %arg2[%c8_82, %c0_83, %c0_84] : memref<9x1x256xf32, #tpu.memory_space<vmem>>, vector<1x1x256xf32>
    %124 = vector.shape_cast %123 : vector<1x1x256xf32> to vector<1x256xf32>
    %125 = vector.broadcast %124 : vector<1x256xf32> to vector<32x256xf32>
    %126 = arith.mulf %122, %125 : vector<32x256xf32>
    %127 = arith.truncf %126 : vector<32x256xf32> to vector<32x256xbf16>
    %c256_85 = arith.constant 256 : index
    %c0_86 = arith.constant 0 : index
    %128 = vector.load %arg8[%c256_85, %c0_86] : memref<288x256xbf16, #tpu.memory_space<vmem>>, vector<32x256xbf16>
    tpu.vector_store %arg8[%c256_85, %c0_86], %127 {strides = array<i32>} : memref<288x256xbf16, #tpu.memory_space<vmem>>, vector<32x256xbf16>,
    %c0_87 = arith.constant 0 : index
    %c0_88 = arith.constant 0 : index
    %129 = vector.load %arg5[%c0_87, %c0_88] : memref<32x288xbf16, #tpu.memory_space<vmem>>, vector<32x288xbf16>
    %c0_89 = arith.constant 0 : index
    %c0_90 = arith.constant 0 : index
    %130 = vector.load %arg8[%c0_89, %c0_90] : memref<288x256xbf16, #tpu.memory_space<vmem>>, vector<288x256xbf16>
    %cst_91 = arith.constant dense<0.000000e+00> : vector<32x256xf32>
    %131 = tpu.matmul %129, %130, %cst_91 {dimension_numbers = #tpu.dot_dimension_numbers<[1], [0], [0], [1], [0, 0, 1, 1], [], []>} : vector<32x288xbf16>, vector<288x256xbf16>, vector<32x256xf32> -> vector<32x256xf32>
    %c0_92 = arith.constant 0 : index
    %c0_93 = arith.constant 0 : index
    %132 = vector.load %arg6[%c0_92, %c0_93] : memref<32x1xf32, #tpu.memory_space<vmem>>, vector<32x1xf32>
    %133 = vector.broadcast %132 : vector<32x1xf32> to vector<32x256xf32>
    %134 = arith.addf %131, %133 : vector<32x256xf32>
    %135 = arith.addf %134, %1 : vector<32x256xf32>
    %c0_94 = arith.constant 0 : index
    %c0_95 = arith.constant 0 : index
    %c0_96 = arith.constant 0 : index
    %136 = vector.load %arg7[%c0_94, %c0_95, %c0_96] : memref<1x32x256xf32, #tpu.memory_space<vmem>>, vector<1x32x256xf32>
    %137 = vector.shape_cast %136 : vector<1x32x256xf32> to vector<32x256xf32>
    %138 = vector.shape_cast %135 : vector<32x256xf32> to vector<1x32x256xf32>
    tpu.vector_store %arg7[%c0_94, %c0_95, %c0_96], %138 {strides = array<i32>} : memref<1x32x256xf32, #tpu.memory_space<vmem>>, vector<1x32x256xf32>,
    return
  }
  func.func @transform_0(%arg0: i32) -> (i32, i32, i32) {
    %c0_i32 = arith.constant 0 : i32
    %c0_i32_0 = arith.constant 0 : i32
    %c0_i32_1 = arith.constant 0 : i32
    return %arg0, %c0_i32, %c0_i32_0 : i32, i32, i32
  }
  func.func @transform_1(%arg0: i32) -> (i32, i32, i32) {
    %c0_i32 = arith.constant 0 : i32
    %c0_i32_0 = arith.constant 0 : i32
    %c0_i32_1 = arith.constant 0 : i32
    %c0_i32_2 = arith.constant 0 : i32
    return %c0_i32, %c0_i32_0, %c0_i32_1 : i32, i32, i32
  }
  func.func @transform_2(%arg0: i32) -> (i32, i32) {
    %c0_i32 = arith.constant 0 : i32
    %c0_i32_0 = arith.constant 0 : i32
    %c0_i32_1 = arith.constant 0 : i32
    return %c0_i32, %c0_i32_0 : i32, i32
  }
  func.func @transform_3(%arg0: i32) -> (i32, i32) {
    %c0_i32 = arith.constant 0 : i32
    %c0_i32_0 = arith.constant 0 : i32
    %c0_i32_1 = arith.constant 0 : i32
    return %c0_i32, %c0_i32_0 : i32, i32
  }
  func.func @transform_4(%arg0: i32) -> (i32, i32) {
    %c0_i32 = arith.constant 0 : i32
    %c0_i32_0 = arith.constant 0 : i32
    %c0_i32_1 = arith.constant 0 : i32
    return %c0_i32, %c0_i32_0 : i32, i32
  }
  func.func @transform_5(%arg0: i32) -> (i32, i32) {
    %c0_i32 = arith.constant 0 : i32
    %c0_i32_0 = arith.constant 0 : i32
    %c0_i32_1 = arith.constant 0 : i32
    return %c0_i32, %c0_i32_0 : i32, i32
  }
  func.func @transform_6(%arg0: i32) -> (i32, i32, i32) {
    %c0_i32 = arith.constant 0 : i32
    %c0_i32_0 = arith.constant 0 : i32
    %c0_i32_1 = arith.constant 0 : i32
    return %arg0, %c0_i32, %c0_i32_0 : i32, i32, i32
  }
}

</mosaic_0001>

<bundles_post_ra>
// kernel: resblock_forward.1
= control target key start
LH: loop header
LB: loop body
LE: loop exit
PB: predicated region body
PF: predicated region fallthrough
CT: control target
= control target key end

     0   :  { %s2781_s21 = smov 0   ;;  %s3760_s0 = inlined_call_operand.vmem [shape: f32[2,32,256], index: 0, kind: input, shape index: {}, may-alias: {0,6}]   ;;  %s3761_s1 = inlined_call_operand.vmem [shape: f32[9,1,256], index: 1, kind: input, shape index: {}]   ;;  %s3762_s2 = inlined_call_operand.vmem [shape: bf16[32,288], index: 2, kind: input, shape index: {}]   ;;  %s3763_s3 = inlined_call_operand.vmem [shape: f32[32,1], index: 3, kind: input, shape index: {}]   ;;  %s3764_s4 = inlined_call_operand.vmem [shape: bf16[32,288], index: 4, kind: input, shape index: {}]   ;;  %s3765_s5 = inlined_call_operand.vmem [shape: f32[32,1], index: 5, kind: input, shape index: {}]   ;;  %s3766_s6 = inlined_call_operand.vmem [shape: f32[2,32,256], index: 6, kind: output, shape index: {}, may-alias: {0,6}]  }
   0x1 LB: > { %s2362_s22 = sadd.s32 4294967295, %s2735_s21   ;;  %p2366_p0 = scmp.ge.s32.totalorder %s2735_s21, 1  ;;  %s2735_s21 = sphi %s2781_s21, %s16_s21  }
   0x2   : > { %p212_p1 = scmp.lt.s32.totalorder %s2735_s21, 3 }
   0x4   : > { %p213_p2 = pnand %p2366_p0, %p212_p1 }
   0x6   : > { %216 = sbr.rel (%p213_p2) target bundleno = 928 (0x3a0), region = 44 }
   0xb   : > { %p242_p3 = scmp.lt.s32.totalorder %s2362_s22, 1  ;;  %s2737_s27 = smov 1   ;;  %v277_v8 = vlaneseq  ;;  %v2714_v11 = vld [vmem:[%s3762_s2 + $0x4] ss:$12 sps:$4 sm:$0xff]   ;;  %v3767_v26 = vmov 0   ;;  %v929_v45 = vld [vmem:[%s3763_s3 + $0x18] sm:$0xff] }
   0xc   : > { %s2738_s28 = smov 15   ;;  %s2739_s29 = smov 16   ;;  %v2385_v14 = vld [vmem:[%s3761_s1 + $0x6] sm:$0x3]  ;;  %1199 = vmatprep.mubr.bf16.mxu0 %v2714_v11  ;;  %1252 = vmatprep.mubr.bf16.mxu1 %v3767_v26  ;;  %v2380_v44 = vld [vmem:[%s3761_s1 + $0x4] sm:$0x3] }
   0xd   : > { %s3812_s22 = smov (!%p242_p3, %s2362_s22), 1  ;;  %s2740_s30 = smov 17   ;;  %v291_v9 = vshrl.u32 %v277_v8, 7  ;;  %v2935_v10 = vand.u32 127, %v277_v8  ;;  %2711 = vset.pattern.permute.xlu1 %v3767_v26  ;;  %2710 = vset.pattern.permute.xlu0 %v3767_v26  ;;  %v928_v46 = vld [vmem:[%s3763_s3 + $0x10] sm:$0xff]  ;;  %v926_v51 = vld [vmem:[%s3763_s3] sm:$0xff] }
   0xe   : > { %s2547_s23 = sshll.u32 %s3812_s22, 6  ;;  %s2741_s7 = smov 112   ;;  %v927_v52 = vld [vmem:[%s3763_s3 + $0x8] sm:$0xff]  ;;  %vm1160_vm8 = vcmask 261120  }
   0xf   : > { %s2797_s26 = scalar_lea.vmem %s3760_s0, %s2547_s23  ;;  %s2742_s8 = smov 113   ;;  %v2940_v12 = vsub.s32 1, %v291_v9  ;;  %v2946_v13 = vsub.s32 0, %v291_v9  ;;  %vm500_vm0 = vcmp.lt.s32.totalorder %v2935_v10, 1  ;;  %vm426_vm1 = vcmp.lt.s32.totalorder %v2935_v10, 15 }
  0x10   : > { %v2800_v0 = vld [vmem:[%s2797_s26 + $0x28] sm:$0xff]  ;;  %v2803_v1 = vld [vmem:[%s2797_s26 + $0x20] sm:$0xff]  ;;  %v2810_v2 = vld [vmem:[%s2797_s26 + $0x38] sm:$0xff]  ;;  %s2743_s9 = smov 127   ;;  %s2744_s12 = smov 111   ;;  %vm352_vm2 = vcmp.lt.s32.totalorder %v2935_v10, 16 }
  0x11   : > { %3779 = vst [vmem:[#allocation3_spill] sm:$0xff] %v2800_v0  ;;  %3780 = vst [vmem:[#allocation4_spill] sm:$0xff] %v2803_v1  ;;  %496 = vrot.lane.b32.xlu1 %v2800_v0, %s2737_s27  ;;  %488 = vrot.lane.b32.xlu0 %v2803_v1, %s2737_s27  ;;  %v2813_v3 = vld [vmem:[%s2797_s26 + $0x30] sm:$0xff]  ;;  %v2823_v5 = vld [vmem:[%s2797_s26] sm:$0xff]  ;;  %v519_v17 = vrot.slane %v2385_v14, %v2940_v12  ;;  %v515_v19 = vrot.slane %v2385_v14, %v2946_v13  ;;  %vm279_vm3 = vcmp.lt.s32.totalorder %v2935_v10, 17  ;;  %s3739_s24 = scalar_lea.vmem %s3766_s6, %s2547_s23 }
  0x12   : > { %3781 = vst [vmem:[#allocation5_spill] sm:$0xff] %v2810_v2  ;;  %3782 = vst [vmem:[#allocation6_spill] sm:$0xff] %v2813_v3  ;;  %v2820_v4 = vld [vmem:[%s2797_s26 + $0x10] sm:$0xff]  ;;  %v2830_v6 = vld [vmem:[%s2797_s26 + $0x18] sm:$0xff]  ;;  %v441_v53 = vrot.slane %v2380_v44, %v2946_v13  ;;  %v445_v54 = vrot.slane %v2380_v44, %v2940_v12  ;;  %vm750_vm4 = vcmp.lt.s32.totalorder %v2935_v10, 112  ;;  %vm676_vm5 = vcmp.lt.s32.totalorder %v2935_v10, 113 }
  0x13   : > { %3783 = vst [vmem:[#allocation7_spill] sm:$0xff] %v2820_v4  ;;  %3784 = vst [vmem:[#allocation8_spill] sm:$0xff] %v2830_v6  ;;  %v2833_v7 = vld [vmem:[%s2797_s26 + $0x8] sm:$0xff]  ;;  %vm602_vm6 = vcmp.lt.s32.totalorder %v2935_v10, 127  ;;  %vm824_vm7 = vcmp.lt.s32.totalorder %v2935_v10, 111 }
  0x14   : > { %3785 = vst [vmem:[#allocation9_spill] sm:$0xff] %v2833_v7 }
  0x15   : > { %498 = vrot.lane.b32.xlu1 %v2810_v2, %s2737_s27  ;;  %490 = vrot.lane.b32.xlu0 %v2813_v3, %s2737_s27 }
  0x19   : > { %486 = vrot.lane.b32.xlu1 %v2820_v4, %s2737_s27  ;;  %484 = vrot.lane.b32.xlu0 %v2823_v5, %s2737_s27 }
  0x1d   : > { %494 = vrot.lane.b32.xlu1 %v2830_v6, %s2737_s27  ;;  %492 = vrot.lane.b32.xlu0 %v2833_v7, %s2737_s27 }
  0x21   : > { %416 = vrot.lane.b32.xlu1 %v2813_v3, %s2738_s28  ;;  %414 = vrot.lane.b32.xlu0 %v2803_v1, %s2738_s28 }
  0x25   : > { %424 = vrot.lane.b32.xlu1 %v2810_v2, %s2738_s28  ;;  %422 = vrot.lane.b32.xlu0 %v2800_v0, %s2738_s28 }
  0x29   : > { %412 = vrot.lane.b32.xlu1 %v2820_v4, %s2738_s28  ;;  %410 = vrot.lane.b32.xlu0 %v2823_v5, %s2738_s28 }
  0x2d   : > { %420 = vrot.lane.b32.xlu1 %v2830_v6, %s2738_s28  ;;  %418 = vrot.lane.b32.xlu0 %v2833_v7, %s2738_s28 }
  0x31   : > { %342 = vrot.lane.b32.xlu1 %v2813_v3, %s2739_s29  ;;  %340 = vrot.lane.b32.xlu0 %v2803_v1, %s2739_s29 }
  0x35   : > { %350 = vrot.lane.b32.xlu1 %v2810_v2, %s2739_s29  ;;  %348 = vrot.lane.b32.xlu0 %v2800_v0, %s2739_s29 }
  0x39   : > { %338 = vrot.lane.b32.xlu1 %v2820_v4, %s2739_s29  ;;  %336 = vrot.lane.b32.xlu0 %v2823_v5, %s2739_s29 }
  0x3d   : > { %346 = vrot.lane.b32.xlu1 %v2830_v6, %s2739_s29  ;;  %344 = vrot.lane.b32.xlu0 %v2833_v7, %s2739_s29 }
  0x41   : > { %267 = vrot.lane.b32.xlu1 %v2813_v3, %s2740_s30  ;;  %265 = vrot.lane.b32.xlu0 %v2803_v1, %s2740_s30 }
  0x45   : > { %275 = vrot.lane.b32.xlu1 %v2810_v2, %s2740_s30  ;;  %273 = vrot.lane.b32.xlu0 %v2800_v0, %s2740_s30 }
  0x49   : > { %263 = vrot.lane.b32.xlu1 %v2820_v4, %s2740_s30  ;;  %261 = vrot.lane.b32.xlu0 %v2823_v5, %s2740_s30 }
  0x4d   : > { %271 = vrot.lane.b32.xlu1 %v2830_v6, %s2740_s30  ;;  %269 = vrot.lane.b32.xlu0 %v2833_v7, %s2740_s30 }
  0x51   : > { %740 = vrot.lane.b32.xlu1 %v2813_v3, %s2741_s7  ;;  %738 = vrot.lane.b32.xlu0 %v2803_v1, %s2741_s7 }
  0x55   : > { %748 = vrot.lane.b32.xlu1 %v2810_v2, %s2741_s7  ;;  %746 = vrot.lane.b32.xlu0 %v2800_v0, %s2741_s7 }
  0x59   : > { %736 = vrot.lane.b32.xlu1 %v2820_v4, %s2741_s7  ;;  %734 = vrot.lane.b32.xlu0 %v2823_v5, %s2741_s7 }
  0x5d   : > { %744 = vrot.lane.b32.xlu1 %v2830_v6, %s2741_s7  ;;  %742 = vrot.lane.b32.xlu0 %v2833_v7, %s2741_s7 }
  0x61   : > { %666 = vrot.lane.b32.xlu1 %v2813_v3, %s2742_s8  ;;  %664 = vrot.lane.b32.xlu0 %v2803_v1, %s2742_s8 }
  0x65   : > { %674 = vrot.lane.b32.xlu1 %v2810_v2, %s2742_s8  ;;  %672 = vrot.lane.b32.xlu0 %v2800_v0, %s2742_s8 }
  0x69   : > { %662 = vrot.lane.b32.xlu1 %v2820_v4, %s2742_s8  ;;  %660 = vrot.lane.b32.xlu0 %v2823_v5, %s2742_s8 }
  0x6d   : > { %670 = vrot.lane.b32.xlu1 %v2830_v6, %s2742_s8  ;;  %668 = vrot.lane.b32.xlu0 %v2833_v7, %s2742_s8 }
  0x71   : > { %592 = vrot.lane.b32.xlu1 %v2813_v3, %s2743_s9  ;;  %590 = vrot.lane.b32.xlu0 %v2803_v1, %s2743_s9 }
  0x75   : > { %600 = vrot.lane.b32.xlu1 %v2810_v2, %s2743_s9  ;;  %598 = vrot.lane.b32.xlu0 %v2800_v0, %s2743_s9 }
  0x79   : > { %588 = vrot.lane.b32.xlu1 %v2820_v4, %s2743_s9  ;;  %586 = vrot.lane.b32.xlu0 %v2823_v5, %s2743_s9 }
  0x7d   : > { %596 = vrot.lane.b32.xlu1 %v2830_v6, %s2743_s9  ;;  %594 = vrot.lane.b32.xlu0 %v2833_v7, %s2743_s9 }
  0x81   : > { %814 = vrot.lane.b32.xlu1 %v2813_v3, %s2744_s12  ;;  %812 = vrot.lane.b32.xlu0 %v2803_v1, %s2744_s12 }
  0x83   : > { %v497_v15 = vpop.permute.xlu1 %496  ;;  %v489_v16 = vpop.permute.xlu0 %488 }
  0x84   : > { %v503_v18 = vsel %vm500_vm0, %v489_v16, %v497_v15  ;;  %v507_v20 = vsel %vm500_vm0, %v497_v15, %v489_v16 }
  0x85   : > { %822 = vrot.lane.b32.xlu1 %v2810_v2, %s2744_s12  ;;  %820 = vrot.lane.b32.xlu0 %v2800_v0, %s2744_s12  ;;  %v527_v25 = vmul.f32 %v519_v17, %v503_v18  ;;  %v526_v28 = vmul.f32 %v515_v19, %v507_v20 }
  0x87   : > { %v499_v21 = vpop.permute.xlu1 %498  ;;  %v491_v22 = vpop.permute.xlu0 %490 }
  0x88   : > { %v508_v23 = vsel %vm500_vm0, %v499_v21, %v491_v22  ;;  %v504_v24 = vsel %vm500_vm0, %v491_v22, %v499_v21 }
  0x89   : > { %810 = vrot.lane.b32.xlu1 %v2820_v4, %s2744_s12  ;;  %808 = vrot.lane.b32.xlu0 %v2823_v5, %s2744_s12  ;;  %v529_v27 = vmul.f32 %v519_v17, %v504_v24  ;;  %v528_v29 = vmul.f32 %v515_v19, %v508_v23 }
  0x8b   : > { %v487_v30 = vpop.permute.xlu1 %486  ;;  %v485_v31 = vpop.permute.xlu0 %484  ;;  %v2636_v32 = vpack.c.bf16 %v529_v27, %v527_v25  ;;  %v2635_v33 = vpack.c.bf16 %v528_v29, %v526_v28  ;;  %v2375_v27 = vld [vmem:[%s3761_s1 + $0x2] sm:$0x3] }
  0x8d   : > { %1167 = vmatprep.subr.bf16.mxu0 %v2636_v32  ;;  %818 = vrot.lane.b32.xlu1 %v2830_v6, %s2744_s12  ;;  %v367_v32 = vrot.slane %v2375_v27, %v2946_v13 }
  0x8e   : > { %816 = vrot.lane.b32.xlu0 %v2833_v7, %s2744_s12  ;;  %1168 = vmatpush1.bf16.msra.mxu0 %v2635_v33  ;;  %v371_v33 = vrot.slane %v2375_v27, %v2940_v12 }
  0x8f   : > { %v495_v34 = vpop.permute.xlu1 %494  ;;  %v493_v35 = vpop.permute.xlu0 %492 }
  0x90   : > { %v502_v36 = vsel %vm500_vm0, %v487_v30, %v495_v34  ;;  %v506_v37 = vsel %vm500_vm0, %v495_v34, %v487_v30  ;;  %v501_v38 = vsel %vm500_vm0, %v485_v31, %v493_v35  ;;  %v505_v39 = vsel %vm500_vm0, %v493_v35, %v485_v31 }
  0x91   : > { %v524_v40 = vmul.f32 %v515_v19, %v506_v37  ;;  %v525_v41 = vmul.f32 %v519_v17, %v502_v36  ;;  %v522_v42 = vmul.f32 %v515_v19, %v505_v39  ;;  %v523_v43 = vmul.f32 %v519_v17, %v501_v38  ;;  %947 = vperm.xlu1 %2711, %v929_v45  }
  0x92   : > { %942 = vperm.xlu0 %2710, %v928_v46  }
  0x93   : > { %v417_v47 = vpop.permute.xlu1 %416  ;;  %v415_v48 = vpop.permute.xlu0 %414  ;;  %v2634_v49 = vpack.c.bf16 %v525_v41, %v523_v43  ;;  %v2633_v50 = vpack.c.bf16 %v524_v40, %v522_v42 }
  0x95   : > { %1169 = vmatprep.subr.bf16.mxu0 %v2634_v49  ;;  %932 = vperm.xlu1 %2711, %v926_v51  }
  0x96   : > { %1170 = vmatpush1.bf16.msra.mxu0 %v2633_v50  ;;  %937 = vperm.xlu0 %2710, %v927_v52  }
  0x97   : > { %v425_v55 = vpop.permute.xlu1 %424  ;;  %v423_v56 = vpop.permute.xlu0 %422 }
  0x98   : > { %v430_v57 = vsel %vm426_vm1, %v417_v47, %v425_v55  ;;  %v434_v58 = vsel %vm426_vm1, %v425_v55, %v417_v47  ;;  %v429_v59 = vsel %vm426_vm1, %v415_v48, %v423_v56  ;;  %v433_v60 = vsel %vm426_vm1, %v423_v56, %v415_v48 }
  0x99   : > { %v454_v61 = vmul.f32 %v441_v53, %v434_v58  ;;  %v455_v62 = vmul.f32 %v445_v54, %v430_v57  ;;  %v452_v63 = vmul.f32 %v441_v53, %v433_v60  ;;  %v453_v8 = vmul.f32 %v445_v54, %v429_v59  ;;  %v288_v58 = vld [vmem:[%s3761_s1] sm:$0x3] }
  0x9b   : > { %v413_v9 = vpop.permute.xlu1 %412  ;;  %v411_v11 = vpop.permute.xlu0 %410  ;;  %v2632_v14 = vpack.c.bf16 %v455_v62, %v453_v8  ;;  %v2631_v15 = vpack.c.bf16 %v454_v61, %v452_v63  ;;  %v293_v63 = vrot.slane %v288_v58, %v2946_v13  ;;  %v297_v8 = vrot.slane %v288_v58, %v2940_v12 }
  0x9d   : > { %1171 = vmatprep.subr.bf16.mxu0 %v2632_v14 }
  0x9e   : > { %1172 = vmatpush1.bf16.msra.mxu0 %v2631_v15 }
  0x9f   : > { %v421_v16 = vpop.permute.xlu1 %420  ;;  %v419_v17 = vpop.permute.xlu0 %418 }
  0xa0   : > { %v428_v18 = vsel %vm426_vm1, %v413_v9, %v421_v16  ;;  %v432_v19 = vsel %vm426_vm1, %v421_v16, %v413_v9  ;;  %v427_v20 = vsel %vm426_vm1, %v411_v11, %v419_v17  ;;  %v431_v21 = vsel %vm426_vm1, %v419_v17, %v411_v11 }
  0xa1   : > { %v450_v22 = vmul.f32 %v441_v53, %v432_v19  ;;  %v451_v23 = vmul.f32 %v445_v54, %v428_v18  ;;  %v448_v24 = vmul.f32 %v441_v53, %v431_v21  ;;  %v449_v25 = vmul.f32 %v445_v54, %v427_v20 }
  0xa3   : > { %v343_v28 = vpop.permute.xlu1 %342  ;;  %v341_v29 = vpop.permute.xlu0 %340  ;;  %v2630_v30 = vpack.c.bf16 %v451_v23, %v449_v25  ;;  %v2629_v31 = vpack.c.bf16 %v450_v22, %v448_v24 }
  0xa5   : > { %1173 = vmatprep.subr.bf16.mxu0 %v2630_v30 }
  0xa6   : > { %1174 = vmatpush1.bf16.msra.mxu0 %v2629_v31 }
  0xa7   : > { %v351_v34 = vpop.permute.xlu1 %350  ;;  %v349_v35 = vpop.permute.xlu0 %348 }
  0xa8   : > { %v356_v36 = vsel %vm352_vm2, %v343_v28, %v351_v34  ;;  %v360_v37 = vsel %vm352_vm2, %v351_v34, %v343_v28  ;;  %v355_v38 = vsel %vm352_vm2, %v341_v29, %v349_v35  ;;  %v359_v39 = vsel %vm352_vm2, %v349_v35, %v341_v29 }
  0xa9   : > { %v380_v40 = vmul.f32 %v367_v32, %v360_v37  ;;  %v381_v41 = vmul.f32 %v371_v33, %v356_v36  ;;  %v378_v42 = vmul.f32 %v367_v32, %v359_v39  ;;  %v379_v43 = vmul.f32 %v371_v33, %v355_v38  ;;  %v2404_v37 = vld [vmem:[%s3761_s1 + $0xe] sm:$0x3] }
  0xab   : > { %v339_v44 = vpop.permute.xlu1 %338  ;;  %v337_v45 = vpop.permute.xlu0 %336  ;;  %v2628_v46 = vpack.c.bf16 %v381_v41, %v379_v43  ;;  %v2627_v47 = vpack.c.bf16 %v380_v40, %v378_v42  ;;  %v765_v42 = vrot.slane %v2404_v37, %v2946_v13  ;;  %v769_v43 = vrot.slane %v2404_v37, %v2940_v12 }
  0xad   : > { %1175 = vmatprep.subr.bf16.mxu0 %v2628_v46 }
  0xae   : > { %1176 = vmatpush1.bf16.msra.mxu0 %v2627_v47 }
  0xaf   : > { %v347_v48 = vpop.permute.xlu1 %346  ;;  %v345_v49 = vpop.permute.xlu0 %344 }
  0xb0   : > { %v354_v50 = vsel %vm352_vm2, %v339_v44, %v347_v48  ;;  %v358_v51 = vsel %vm352_vm2, %v347_v48, %v339_v44  ;;  %v353_v52 = vsel %vm352_vm2, %v337_v45, %v345_v49  ;;  %v357_v53 = vsel %vm352_vm2, %v345_v49, %v337_v45 }
  0xb1   : > { %v376_v54 = vmul.f32 %v367_v32, %v358_v51  ;;  %v377_v55 = vmul.f32 %v371_v33, %v354_v50  ;;  %v374_v56 = vmul.f32 %v367_v32, %v357_v53  ;;  %v375_v57 = vmul.f32 %v371_v33, %v353_v52 }
  0xb3   : > { %v268_v59 = vpop.permute.xlu1 %267  ;;  %v266_v60 = vpop.permute.xlu0 %265  ;;  %v2626_v61 = vpack.c.bf16 %v377_v55, %v375_v57  ;;  %v2625_v62 = vpack.c.bf16 %v376_v54, %v374_v56 }
  0xb5   : > { %1177 = vmatprep.subr.bf16.mxu0 %v2626_v61 }
  0xb6   : > { %1178 = vmatpush1.bf16.msra.mxu0 %v2625_v62 }
  0xb7   : > { %v276_v9 = vpop.permute.xlu1 %275  ;;  %v274_v11 = vpop.permute.xlu0 %273 }
  0xb8   : > { %v283_v14 = vsel %vm279_vm3, %v268_v59, %v276_v9  ;;  %v287_v15 = vsel %vm279_vm3, %v276_v9, %v268_v59  ;;  %v282_v16 = vsel %vm279_vm3, %v266_v60, %v274_v11  ;;  %v286_v17 = vsel %vm279_vm3, %v274_v11, %v266_v60 }
  0xb9   : > { %v306_v18 = vmul.f32 %v293_v63, %v287_v15  ;;  %v307_v19 = vmul.f32 %v297_v8, %v283_v14  ;;  %v304_v20 = vmul.f32 %v293_v63, %v286_v17  ;;  %v305_v21 = vmul.f32 %v297_v8, %v282_v16  ;;  %v2399_v15 = vld [vmem:[%s3761_s1 + $0xc] sm:$0x3] }
  0xbb   : > { %v264_v22 = vpop.permute.xlu1 %263  ;;  %v262_v23 = vpop.permute.xlu0 %261  ;;  %v2624_v24 = vpack.c.bf16 %v307_v19, %v305_v21  ;;  %v2623_v25 = vpack.c.bf16 %v306_v18, %v304_v20  ;;  %v691_v20 = vrot.slane %v2399_v15, %v2946_v13  ;;  %v695_v21 = vrot.slane %v2399_v15, %v2940_v12 }
  0xbd   : > { %1179 = vmatprep.subr.bf16.mxu0 %v2624_v24 }
  0xbe   : > { %1180 = vmatpush1.bf16.msra.mxu0 %v2623_v25 }
  0xbf   : > { %v272_v27 = vpop.permute.xlu1 %271  ;;  %v270_v28 = vpop.permute.xlu0 %269 }
  0xc0   : > { %v281_v29 = vsel %vm279_vm3, %v264_v22, %v272_v27  ;;  %v285_v30 = vsel %vm279_vm3, %v272_v27, %v264_v22  ;;  %v280_v31 = vsel %vm279_vm3, %v262_v23, %v270_v28  ;;  %v284_v32 = vsel %vm279_vm3, %v270_v28, %v262_v23 }
  0xc1   : > { %v302_v33 = vmul.f32 %v293_v63, %v285_v30  ;;  %v303_v34 = vmul.f32 %v297_v8, %v281_v29  ;;  %v300_v35 = vmul.f32 %v293_v63, %v284_v32  ;;  %v301_v36 = vmul.f32 %v297_v8, %v280_v31 }
  0xc3   : > { %v741_v38 = vpop.permute.xlu1 %740  ;;  %v739_v39 = vpop.permute.xlu0 %738  ;;  %v2622_v40 = vpack.c.bf16 %v303_v34, %v301_v36  ;;  %v2621_v41 = vpack.c.bf16 %v302_v33, %v300_v35 }
  0xc5   : > { %1181 = vmatprep.subr.bf16.mxu0 %v2622_v40 }
  0xc6   : > { %1182 = vmatpush1.bf16.msra.mxu0 %v2621_v41 }
  0xc7   : > { %v749_v44 = vpop.permute.xlu1 %748  ;;  %v747_v45 = vpop.permute.xlu0 %746 }
  0xc8   : > { %v754_v46 = vsel %vm750_vm4, %v741_v38, %v749_v44  ;;  %v758_v47 = vsel %vm750_vm4, %v749_v44, %v741_v38  ;;  %v753_v48 = vsel %vm750_vm4, %v739_v39, %v747_v45  ;;  %v757_v49 = vsel %vm750_vm4, %v747_v45, %v739_v39 }
  0xc9   : > { %v778_v50 = vmul.f32 %v765_v42, %v754_v46  ;;  %v779_v51 = vmul.f32 %v769_v43, %v758_v47  ;;  %v776_v52 = vmul.f32 %v765_v42, %v753_v48  ;;  %v777_v53 = vmul.f32 %v769_v43, %v757_v49  ;;  %v2394_v47 = vld [vmem:[%s3761_s1 + $0xa] sm:$0x3] }
  0xcb   : > { %v737_v54 = vpop.permute.xlu1 %736  ;;  %v735_v55 = vpop.permute.xlu0 %734  ;;  %v2652_v56 = vpack.c.bf16 %v779_v51, %v777_v53  ;;  %v2651_v57 = vpack.c.bf16 %v778_v50, %v776_v52  ;;  %v617_v52 = vrot.slane %v2394_v47, %v2946_v13  ;;  %v621_v53 = vrot.slane %v2394_v47, %v2940_v12 }
  0xcd   : > { %1183 = vmatprep.subr.bf16.mxu0 %v2652_v56 }
  0xce   : > { %1184 = vmatpush2.bf16.msra.mxu0 %v2651_v57 }
  0xcf   : > { %v745_v58 = vpop.permute.xlu1 %744  ;;  %v743_v59 = vpop.permute.xlu0 %742 }
  0xd0   : > { %v752_v60 = vsel %vm750_vm4, %v737_v54, %v745_v58  ;;  %v756_v61 = vsel %vm750_vm4, %v745_v58, %v737_v54  ;;  %v751_v62 = vsel %vm750_vm4, %v735_v55, %v743_v59  ;;  %v755_v63 = vsel %vm750_vm4, %v743_v59, %v735_v55 }
  0xd1   : > { %v774_v8 = vmul.f32 %v765_v42, %v752_v60  ;;  %v775_v9 = vmul.f32 %v769_v43, %v756_v61  ;;  %v772_v11 = vmul.f32 %v765_v42, %v751_v62  ;;  %v773_v14 = vmul.f32 %v769_v43, %v755_v63 }
  0xd3   : > { %v667_v16 = vpop.permute.xlu1 %666  ;;  %v665_v17 = vpop.permute.xlu0 %664  ;;  %v2650_v18 = vpack.c.bf16 %v775_v9, %v773_v14  ;;  %v2649_v19 = vpack.c.bf16 %v774_v8, %v772_v11 }
  0xd5   : > { %1185 = vmatprep.subr.bf16.mxu0 %v2650_v18 }
  0xd6   : > { %1186 = vmatpush2.bf16.msra.mxu0 %v2649_v19 }
  0xd7   : > { %v675_v22 = vpop.permute.xlu1 %674  ;;  %v673_v23 = vpop.permute.xlu0 %672 }
  0xd8   : > { %v680_v24 = vsel %vm676_vm5, %v667_v16, %v675_v22  ;;  %v684_v25 = vsel %vm676_vm5, %v675_v22, %v667_v16  ;;  %v679_v27 = vsel %vm676_vm5, %v665_v17, %v673_v23  ;;  %v683_v28 = vsel %vm676_vm5, %v673_v23, %v665_v17 }
  0xd9   : > { %v704_v29 = vmul.f32 %v691_v20, %v680_v24  ;;  %v705_v30 = vmul.f32 %v695_v21, %v684_v25  ;;  %v702_v31 = vmul.f32 %v691_v20, %v679_v27  ;;  %v703_v32 = vmul.f32 %v695_v21, %v683_v28  ;;  %v2409_v25 = vld [vmem:[%s3761_s1 + $0x10] sm:$0x3] }
  0xdb   : > { %v663_v33 = vpop.permute.xlu1 %662  ;;  %v661_v34 = vpop.permute.xlu0 %660  ;;  %v2648_v35 = vpack.c.bf16 %v705_v30, %v703_v32  ;;  %v2647_v36 = vpack.c.bf16 %v704_v29, %v702_v31  ;;  %v2640_v31 = vpack.c.bf16 %v2810_v2, %v2800_v0  ;;  %v839_v32 = vrot.slane %v2409_v25, %v2946_v13 }
  0xdd   : > { %1187 = vmatprep.subr.bf16.mxu0 %v2648_v35 }
  0xde   : > { %1188 = vmatpush2.bf16.msra.mxu0 %v2647_v36 }
  0xdf   : > { %v671_v37 = vpop.permute.xlu1 %670  ;;  %v669_v38 = vpop.permute.xlu0 %668 }
  0xe0   : > { %v678_v39 = vsel %vm676_vm5, %v663_v33, %v671_v37  ;;  %v682_v40 = vsel %vm676_vm5, %v671_v37, %v663_v33  ;;  %v677_v41 = vsel %vm676_vm5, %v661_v34, %v669_v38  ;;  %v681_v42 = vsel %vm676_vm5, %v669_v38, %v661_v34 }
  0xe1   : > { %v700_v43 = vmul.f32 %v691_v20, %v678_v39  ;;  %v701_v44 = vmul.f32 %v695_v21, %v682_v40  ;;  %v698_v45 = vmul.f32 %v691_v20, %v677_v41  ;;  %v699_v46 = vmul.f32 %v695_v21, %v681_v42 }
  0xe2   : > { %v843_v33 = vrot.slane %v2409_v25, %v2940_v12  ;;  %v2639_v34 = vpack.c.bf16 %v2813_v3, %v2803_v1  ;;  %v2638_v37 = vpack.c.bf16 %v2830_v6, %v2833_v7 }
  0xe3   : > { %v593_v48 = vpop.permute.xlu1 %592  ;;  %v591_v49 = vpop.permute.xlu0 %590  ;;  %v2646_v50 = vpack.c.bf16 %v701_v44, %v699_v46  ;;  %v2645_v51 = vpack.c.bf16 %v700_v43, %v698_v45  ;;  %v2637_v46 = vpack.c.bf16 %v2820_v4, %v2823_v5 }
  0xe5   : > { %1189 = vmatprep.subr.bf16.mxu0 %v2646_v50 }
  0xe6   : > { %1190 = vmatpush2.bf16.msra.mxu0 %v2645_v51  ;;  %v2712_v51 = vld [vmem:[%s3762_s2] ss:$12 sps:$4 sm:$0xff]  }
  0xe7   : > { %v601_v54 = vpop.permute.xlu1 %600  ;;  %v599_v55 = vpop.permute.xlu0 %598 }
  0xe8   : > { %v606_v56 = vsel %vm602_vm6, %v593_v48, %v601_v54  ;;  %v610_v57 = vsel %vm602_vm6, %v601_v54, %v593_v48  ;;  %v605_v58 = vsel %vm602_vm6, %v591_v49, %v599_v55  ;;  %v609_v59 = vsel %vm602_vm6, %v599_v55, %v591_v49 }
  0xe9   : > { %v630_v60 = vmul.f32 %v617_v52, %v606_v56  ;;  %v631_v61 = vmul.f32 %v621_v53, %v610_v57  ;;  %v628_v62 = vmul.f32 %v617_v52, %v605_v58  ;;  %v629_v63 = vmul.f32 %v621_v53, %v609_v59 }
  0xeb   : > { %v589_v8 = vpop.permute.xlu1 %588  ;;  %v587_v9 = vpop.permute.xlu0 %586  ;;  %v2644_v11 = vpack.c.bf16 %v631_v61, %v629_v63  ;;  %v2643_v14 = vpack.c.bf16 %v630_v60, %v628_v62 }
  0xed   : > { %1191 = vmatprep.subr.bf16.mxu0 %v2644_v11  ;;  %v2719_v11 = vld [vmem:[%s3762_s2 + $0x20] ss:$12 sps:$4 sm:$0xff]  }
  0xee   : > { %1192 = vmatpush2.bf16.msra.mxu0 %v2643_v14 }
  0xef   : > { %v597_v15 = vpop.permute.xlu1 %596  ;;  %v595_v16 = vpop.permute.xlu0 %594 }
  0xf0   : > { %v604_v17 = vsel %vm602_vm6, %v589_v8, %v597_v15  ;;  %v608_v18 = vsel %vm602_vm6, %v597_v15, %v589_v8  ;;  %v603_v19 = vsel %vm602_vm6, %v587_v9, %v595_v16  ;;  %v607_v20 = vsel %vm602_vm6, %v595_v16, %v587_v9  ;;  %v2717_v8 = vld [vmem:[%s3762_s2 + $0x18] ss:$12 sps:$4 sm:$0xff]   ;;  %v2718_v9 = vld [vmem:[%s3762_s2 + $0x8] ss:$12 sps:$4 sm:$0xff]  }
  0xf1   : > { %v626_v21 = vmul.f32 %v617_v52, %v604_v17  ;;  %v627_v22 = vmul.f32 %v621_v53, %v608_v18  ;;  %v624_v23 = vmul.f32 %v617_v52, %v603_v19  ;;  %v625_v24 = vmul.f32 %v621_v53, %v607_v20  ;;  %v2715_v52 = vld [vmem:[%s3762_s2 + $0x1c] ss:$12 sps:$4 sm:$0xff]  }
  0xf3   : > { %v815_v27 = vpop.permute.xlu1 %814  ;;  %v813_v28 = vpop.permute.xlu0 %812  ;;  %v2642_v29 = vpack.c.bf16 %v627_v22, %v625_v24  ;;  %v2641_v30 = vpack.c.bf16 %v626_v21, %v624_v23 }
  0xf5   : > { %1193 = vmatprep.subr.bf16.mxu0 %v2642_v29 }
  0xf6   : > { %1194 = vmatpush2.bf16.msra.mxu0 %v2641_v30 }
  0xf7   : > { %v823_v35 = vpop.permute.xlu1 %822  ;;  %v821_v36 = vpop.permute.xlu0 %820  ;;  %1195 = vmatprep.subr.bf16.mxu0 %v2640_v31 }
  0xf8   : > { %v828_v38 = vsel %vm824_vm7, %v815_v27, %v823_v35  ;;  %v832_v39 = vsel %vm824_vm7, %v823_v35, %v815_v27  ;;  %v827_v40 = vsel %vm824_vm7, %v813_v28, %v821_v36  ;;  %v831_v41 = vsel %vm824_vm7, %v821_v36, %v813_v28 }
  0xf9   : > { %v852_v42 = vmul.f32 %v839_v32, %v828_v38  ;;  %v850_v43 = vmul.f32 %v839_v32, %v827_v40  ;;  %v851_v44 = vmul.f32 %v843_v33, %v831_v41  ;;  %v853_v45 = vmul.f32 %v843_v33, %v832_v39 }
  0xfa   : > { %1196 = vmatpush2.bf16.msra.mxu0 %v2639_v34 }
  0xfb   : > { %v811_v47 = vpop.permute.xlu1 %810  ;;  %v809_v48 = vpop.permute.xlu0 %808  ;;  %1197 = vmatprep.subr.bf16.mxu0 %v2638_v37  ;;  %v2656_v49 = vpack.c.bf16 %v853_v45, %v851_v44  ;;  %v2655_v50 = vpack.c.bf16 %v852_v42, %v850_v43 }
  0xfd   : > { %1232 = vmatprep.subr.bf16.mxu1 %v2656_v49 }
  0xfe   : > { %1198 = vmatpush2.bf16.msra.mxu0 %v2637_v46  ;;  %1233 = vmatpush1.bf16.msra.mxu1 %v2655_v50 }
  0xff   : > { %v819_v53 = vpop.permute.xlu1 %818 }
 0x100   : > { %v826_v5 = vsel %vm824_vm7, %v811_v47, %v819_v53  ;;  %v830_v54 = vsel %vm824_vm7, %v819_v53, %v811_v47  ;;  %v817_v55 = vpop.permute.xlu0 %816 }
 0x101   : > { %v848_v56 = vmul.f32 %v839_v32, %v826_v5  ;;  %v849_v57 = vmul.f32 %v843_v33, %v830_v54  ;;  %v825_v58 = vsel %vm824_vm7, %v809_v48, %v817_v55  ;;  %v829_v59 = vsel %vm824_vm7, %v817_v55, %v809_v48  ;;  %1200 = vmatmul.mubr.bf16.vlgmr.msra.gmra.mxu0 %v2712_v51 }
 0x102   : > { %v846_v60 = vmul.f32 %v839_v32, %v825_v58  ;;  %v847_v61 = vmul.f32 %v843_v33, %v829_v59  ;;  %1209 = vmatprep.mubr.bf16.mxu0 %v2715_v52 }
 0x104   : > { %v2654_v62 = vpack.c.bf16 %v849_v57, %v847_v61  ;;  %v2653_v63 = vpack.c.bf16 %v848_v56, %v846_v60 }
 0x106   : > { %1234 = vmatprep.subr.bf16.mxu1 %v2654_v62 }
 0x107   : > { %1235 = vmatpush1.bf16.msra.mxu1 %v2653_v63 }
 0x109   : > { %1210 = vmatmul.mubr.bf16.gmra.mxu0 %v2717_v8 }
 0x10a   : > { %2456 = vmatmul.mubr.msk.bf16.vlgmr.msra.gmra.mxu1 %vm1160_vm8, %v2718_v9  ;;  %2270 = vmatprep.mubr.bf16.mxu0 %v3767_v26 }
 0x10b   : > { %1262 = vmatprep.mubr.bf16.mxu1 %v3767_v26 }
 0x10c   : > { %v3178_v14 = vpop.permute.xlu1 %947 }
 0x10d   : > { %v3180_v15 = vpop.permute.xlu0 %942 }
 0x110   : > { %v933_v17 = vpop.permute.xlu1 %932 }
 0x111   : > { %v938_v20 = vpop.permute.xlu0 %937 }
 0x112   : > { %2457 = vmatmul.mubr.msk.bf16.gmra.mxu1 %vm1160_vm8, %v2719_v11 }
 0x1c1   : > { %v1201_v16 = vpop.f32.mrf.mxu0 }
 0x1c2   : > { %v1202_v18 = vadd.f32 %v1201_v16, %v933_v17 }
 0x1c3   : > { %v1203_v19 = vpop.f32.mrf.mxu0 }
 0x1c4   : > { %v1204_v33 = vadd.f32 %v1203_v19, %v933_v17  ;;  %v1945_v19 = vld [vmem:[%s3765_s5] sm:$0xff] }
 0x1c5   : > { %v1205_v23 = vpop.f32.mrf.mxu0 }
 0x1c6   : > { %v1206_v25 = vadd.f32 %v1205_v23, %v938_v20  ;;  %v1947_v23 = vld [vmem:[%s3765_s5 + $0x10] sm:$0xff] }
 0x1c7   : > { %v1207_v34 = vpop.f32.mrf.mxu0 }
 0x1c8   : > { %v1208_v37 = vadd.f32 %v1207_v34, %v938_v20 }
 0x1c9   : > { %v1211_v42 = vpop.f32.mrf.mxu0 }
 0x1ca   : > { %v1254_v21 = vpop.f32.mrf.mxu1  ;;  %v1212_v47 = vadd.f32 %v1211_v42, %v3180_v15 }
 0x1cb   : > { %v1255_v22 = vadd.f32 %v1254_v21, %v1202_v18  ;;  %v1213_v45 = vpop.f32.mrf.mxu0 }
 0x1cc   : > { %v1256_v24 = vpop.f32.mrf.mxu1  ;;  %v1214_v56 = vadd.f32 %v1213_v45, %v3180_v15  ;;  %v2462_v45 = vld [vmem:[%s3761_s1 + $0x2] sm:$0x3] }
 0x1cd   : > { %vm1273_vm9 = vcmp.gt.f32.partialorder %v1255_v22, 0.0  ;;  %v1281_v27 = vmul.f32 0.01, %v1255_v22  ;;  %v1257_v35 = vadd.f32 %v1256_v24, %v1204_v33  ;;  %v1215_v48 = vpop.f32.mrf.mxu0 }
 0x1ce   : > { %v1258_v28 = vpop.f32.mrf.mxu1  ;;  %v1216_v51 = vadd.f32 %v1215_v48, %v3178_v14 }
 0x1cf   : > { %v3182_v29 = vsel %vm1273_vm9, %v1255_v22, %v1281_v27  ;;  %v1259_v30 = vadd.f32 %v1258_v28, %v1206_v25  ;;  %v1282_v38 = vmul.f32 0.01, %v1257_v35  ;;  %vm1274_vm11 = vcmp.gt.f32.partialorder %v1257_v35, 0.0  ;;  %v1217_v57 = vpop.f32.mrf.mxu0  ;;  %v1946_v22 = vld [vmem:[%s3765_s5 + $0x8] sm:$0xff]  ;;  %v3351_v27 = vld [vmem:[%s3761_s1 + $0x6] sm:$0x3] }
 0x1d0   : > { %3786 = vst [vmem:[#allocation10_spill] sm:$0xff] %v3182_v29  ;;  %1513 = vrot.lane.b32.xlu1 %v3182_v29, %s2737_s27  ;;  %v1260_v36 = vpop.f32.mrf.mxu1  ;;  %v1218_v60 = vadd.f32 %v1217_v57, %v3178_v14  ;;  %v2722_v14 = vld [vmem:[%s3764_s4 + $0x4] ss:$12 sps:$4 sm:$0xff]   ;;  %v1948_v28 = vld [vmem:[%s3765_s5 + $0x18] sm:$0xff]  ;;  %v3362_v33 = vrot.slane %v3351_v27, %v2946_v13 }
 0x1d1   : > { %vm1275_vm10 = vcmp.gt.f32.partialorder %v1259_v30, 0.0  ;;  %v1283_v31 = vmul.f32 0.01, %v1259_v30  ;;  %v1261_v39 = vadd.f32 %v1260_v36, %v1208_v37  ;;  %v3204_v40 = vsel %vm1274_vm11, %v1257_v35, %v1282_v38  ;;  %2217 = vmatprep.mubr.bf16.mxu1 %v2722_v14  ;;  %v2467_v35 = vld [vmem:[%s3761_s1 + $0x4] sm:$0x3] }
 0x1d2   : > { %3788 = vst [vmem:[#allocation12_spill] sm:$0xff] %v3204_v40  ;;  %v1264_v44 = vpop.f32.mrf.mxu1  ;;  %v3384_v42 = vrot.slane %v2467_v35, %v2946_v13 }
 0x1d3   : > { %v3186_v32 = vsel %vm1275_vm10, %v1259_v30, %v1283_v31  ;;  %v1284_v41 = vmul.f32 0.01, %v1261_v39  ;;  %vm1276_vm12 = vcmp.gt.f32.partialorder %v1261_v39, 0.0  ;;  %v1265_v49 = vadd.f32 %v1264_v44, %v1212_v47 }
 0x1d4   : > { %3787 = vst [vmem:[#allocation11_spill] sm:$0xff] %v3186_v32  ;;  %1515 = vrot.lane.b32.xlu0 %v3186_v32, %s2737_s27  ;;  %1441 = vrot.lane.b32.xlu1 %v3182_v29, %s2738_s28  ;;  %v1266_v46 = vpop.f32.mrf.mxu1  ;;  %v3387_v44 = vrot.slane %v2467_v35, %v2940_v12 }
 0x1d5   : > { %v3210_v43 = vsel %vm1276_vm12, %v1261_v39, %v1284_v41  ;;  %v1285_v52 = vmul.f32 0.01, %v1265_v49  ;;  %vm1277_vm13 = vcmp.gt.f32.partialorder %v1265_v49, 0.0  ;;  %v1267_v58 = vadd.f32 %v1266_v46, %v1214_v56 }
 0x1d6   : > { %3789 = vst [vmem:[#allocation13_spill] sm:$0xff] %v3210_v43  ;;  %v1268_v50 = vpop.f32.mrf.mxu1 }
 0x1d7   : > { %v1269_v53 = vadd.f32 %v1268_v50, %v1216_v51  ;;  %v3230_v5 = vsel %vm1277_vm13, %v1265_v49, %v1285_v52  ;;  %v1286_v61 = vmul.f32 0.01, %v1267_v58  ;;  %vm1278_vm15 = vcmp.gt.f32.partialorder %v1267_v58, 0.0 }
 0x1d8   : > { %1443 = vrot.lane.b32.xlu0 %v3186_v32, %s2738_s28  ;;  %1369 = vrot.lane.b32.xlu1 %v3182_v29, %s2739_s29  ;;  %v1270_v59 = vpop.f32.mrf.mxu1 }
 0x1d9   : > { %v1287_v54 = vmul.f32 0.01, %v1269_v53  ;;  %vm1279_vm14 = vcmp.gt.f32.partialorder %v1269_v53, 0.0  ;;  %v1271_v62 = vadd.f32 %v1270_v59, %v1218_v60  ;;  %v3256_v63 = vsel %vm1278_vm15, %v1267_v58, %v1286_v61  ;;  %v1321_v60 = vld [vmem:[%s3761_s1] sm:$0x3] }
 0x1db   : > { %v3236_v55 = vsel %vm1279_vm14, %v1269_v53, %v1287_v54  ;;  %v1288_v8 = vmul.f32 0.01, %v1271_v62  ;;  %vm1280_vm9 = vcmp.gt.f32.partialorder %v1271_v62, 0.0  ;;  %v3403_v53 = vrot.slane %v2462_v45, %v2946_v13 }
 0x1dc   : > { %1371 = vrot.lane.b32.xlu0 %v3186_v32, %s2739_s29  ;;  %1297 = vrot.lane.b32.xlu1 %v3182_v29, %s2740_s30  ;;  %v3406_v54 = vrot.slane %v2462_v45, %v2940_v12 }
 0x1dd   : > { %v3262_v9 = vsel %vm1280_vm9, %v1271_v62, %v1288_v8 }
 0x1e0   : > { %1299 = vrot.lane.b32.xlu0 %v3186_v32, %s2740_s30  ;;  %1757 = vrot.lane.b32.xlu1 %v3182_v29, %s2741_s7 }
 0x1e4   : > { %1759 = vrot.lane.b32.xlu0 %v3186_v32, %s2741_s7  ;;  %1521 = vrot.lane.b32.xlu1 %v3204_v40, %s2737_s27 }
 0x1e8   : > { %1523 = vrot.lane.b32.xlu0 %v3210_v43, %s2737_s27  ;;  %1449 = vrot.lane.b32.xlu1 %v3204_v40, %s2738_s28 }
 0x1ec   : > { %1451 = vrot.lane.b32.xlu0 %v3210_v43, %s2738_s28  ;;  %1377 = vrot.lane.b32.xlu1 %v3204_v40, %s2739_s29 }
 0x1f0   : > { %1379 = vrot.lane.b32.xlu0 %v3210_v43, %s2739_s29  ;;  %1305 = vrot.lane.b32.xlu1 %v3204_v40, %s2740_s30 }
 0x1f4   : > { %1307 = vrot.lane.b32.xlu0 %v3210_v43, %s2740_s30  ;;  %1765 = vrot.lane.b32.xlu1 %v3204_v40, %s2741_s7 }
 0x1f8   : > { %1767 = vrot.lane.b32.xlu0 %v3210_v43, %s2741_s7  ;;  %1517 = vrot.lane.b32.xlu1 %v3230_v5, %s2737_s27 }
 0x1fc   : > { %1519 = vrot.lane.b32.xlu0 %v3236_v55, %s2737_s27  ;;  %1445 = vrot.lane.b32.xlu1 %v3230_v5, %s2738_s28 }
 0x200   : > { %1447 = vrot.lane.b32.xlu0 %v3236_v55, %s2738_s28  ;;  %1373 = vrot.lane.b32.xlu1 %v3230_v5, %s2739_s29 }
 0x204   : > { %1375 = vrot.lane.b32.xlu0 %v3236_v55, %s2739_s29  ;;  %1301 = vrot.lane.b32.xlu1 %v3230_v5, %s2740_s30 }
 0x208   : > { %1303 = vrot.lane.b32.xlu0 %v3236_v55, %s2740_s30  ;;  %1761 = vrot.lane.b32.xlu1 %v3230_v5, %s2741_s7 }
 0x20c   : > { %1763 = vrot.lane.b32.xlu0 %v3236_v55, %s2741_s7  ;;  %1525 = vrot.lane.b32.xlu1 %v3256_v63, %s2737_s27 }
 0x210   : > { %1527 = vrot.lane.b32.xlu0 %v3262_v9, %s2737_s27  ;;  %1689 = vrot.lane.b32.xlu1 %v3230_v5, %s2742_s8 }
 0x214   : > { %1691 = vrot.lane.b32.xlu0 %v3236_v55, %s2742_s8  ;;  %1453 = vrot.lane.b32.xlu1 %v3256_v63, %s2738_s28 }
 0x218   : > { %1455 = vrot.lane.b32.xlu0 %v3262_v9, %s2738_s28  ;;  %1381 = vrot.lane.b32.xlu1 %v3256_v63, %s2739_s29 }
 0x21c   : > { %1687 = vrot.lane.b32.xlu0 %v3186_v32, %s2742_s8  ;;  %1309 = vrot.lane.b32.xlu1 %v3256_v63, %s2740_s30 }
 0x220   : > { %1383 = vrot.lane.b32.xlu0 %v3262_v9, %s2739_s29  ;;  %1769 = vrot.lane.b32.xlu1 %v3256_v63, %s2741_s7 }
 0x224   : > { %1695 = vrot.lane.b32.xlu0 %v3210_v43, %s2742_s8  ;;  %1697 = vrot.lane.b32.xlu1 %v3256_v63, %s2742_s8 }
 0x228   : > { %1311 = vrot.lane.b32.xlu0 %v3262_v9, %s2740_s30  ;;  %1685 = vrot.lane.b32.xlu1 %v3182_v29, %s2742_s8 }
 0x22c   : > { %1619 = vrot.lane.b32.xlu0 %v3236_v55, %s2743_s9  ;;  %1693 = vrot.lane.b32.xlu1 %v3204_v40, %s2742_s8 }
 0x230   : > { %1771 = vrot.lane.b32.xlu0 %v3262_v9, %s2741_s7  ;;  %1617 = vrot.lane.b32.xlu1 %v3230_v5, %s2743_s9 }
 0x234   : > { %1615 = vrot.lane.b32.xlu0 %v3186_v32, %s2743_s9  ;;  %1625 = vrot.lane.b32.xlu1 %v3256_v63, %s2743_s9 }
 0x238   : > { %1699 = vrot.lane.b32.xlu0 %v3262_v9, %s2742_s8  ;;  %1613 = vrot.lane.b32.xlu1 %v3182_v29, %s2743_s9 }
 0x23c   : > { %1623 = vrot.lane.b32.xlu0 %v3210_v43, %s2743_s9  ;;  %1621 = vrot.lane.b32.xlu1 %v3204_v40, %s2743_s9 }
 0x240   : > { %1627 = vrot.lane.b32.xlu0 %v3262_v9, %s2743_s9  ;;  %1833 = vrot.lane.b32.xlu1 %v3230_v5, %s2744_s12 }
 0x242   : > { %v3316_v11 = vpop.permute.xlu1 %1513 }
 0x244   : > { %1835 = vrot.lane.b32.xlu0 %v3236_v55, %s2744_s12  ;;  %1841 = vrot.lane.b32.xlu1 %v3256_v63, %s2744_s12 }
 0x246   : > { %v3325_v15 = vpop.permute.xlu0 %1515  ;;  %v1442_v16 = vpop.permute.xlu1 %1441 }
 0x248   : > { %1831 = vrot.lane.b32.xlu0 %v3186_v32, %s2744_s12  ;;  %1829 = vrot.lane.b32.xlu1 %v3182_v29, %s2744_s12 }
 0x24a   : > { %v1444_v17 = vpop.permute.xlu0 %1443  ;;  %v1370_v18 = vpop.permute.xlu1 %1369 }
 0x24c   : > { %1843 = vrot.lane.b32.xlu0 %v3262_v9, %s2744_s12  ;;  %1837 = vrot.lane.b32.xlu1 %v3204_v40, %s2744_s12 }
 0x24e   : > { %v1372_v20 = vpop.permute.xlu0 %1371  ;;  %v1298_v21 = vpop.permute.xlu1 %1297 }
 0x250   : > { %1839 = vrot.lane.b32.xlu0 %v3210_v43, %s2744_s12  ;;  %1951 = vperm.xlu1 %2711, %v1945_v19  }
 0x252   : > { %v1300_v24 = vpop.permute.xlu0 %1299  ;;  %v3346_v25 = vpop.permute.xlu1 %1757 }
 0x254   : > { %1956 = vperm.xlu0 %2710, %v1946_v22   ;;  %1961 = vperm.xlu1 %2711, %v1947_v23   ;;  %v3436_v23 = vrot.slane %v1321_v60, %v2946_v13 }
 0x256   : > { %v3356_v30 = vpop.permute.xlu0 %1759  ;;  %v3358_v31 = vpop.permute.xlu1 %1521 }
 0x257   : > { %v1533_v34 = vsel %vm500_vm0, %v3358_v31, %v3316_v11  ;;  %v1529_v1 = vsel %vm500_vm0, %v3316_v11, %v3358_v31 }
 0x258   : > { %1966 = vperm.xlu0 %2710, %v1948_v28   ;;  %v3378_v39 = vmul.f32 %v3362_v33, %v1533_v34  ;;  %v3439_v28 = vrot.slane %v1321_v60, %v2940_v12 }
 0x25a   : > { %v3371_v36 = vpop.permute.xlu0 %1523  ;;  %v1450_v37 = vpop.permute.xlu1 %1449 }
 0x25b   : > { %v1534_v38 = vsel %vm500_vm0, %v3371_v36, %v3325_v15  ;;  %v1457_v46 = vsel %vm426_vm1, %v1442_v16, %v1450_v37  ;;  %v1461_v47 = vsel %vm426_vm1, %v1450_v37, %v1442_v16 }
 0x25c   : > { %v3381_v41 = vmul.f32 %v3362_v33, %v1534_v38  ;;  %v3409_v56 = vmul.f32 %v3384_v42, %v1461_v47  ;;  %v3412_v57 = vmul.f32 %v3387_v44, %v1457_v46 }
 0x25e   : > { %v1452_v49 = vpop.permute.xlu0 %1451  ;;  %v1378_v50 = vpop.permute.xlu1 %1377 }
 0x25f   : > { %v1458_v51 = vsel %vm426_vm1, %v1444_v17, %v1452_v49  ;;  %v1462_v52 = vsel %vm426_vm1, %v1452_v49, %v1444_v17  ;;  %v1385_v61 = vsel %vm352_vm2, %v1370_v18, %v1378_v50  ;;  %v1389_v62 = vsel %vm352_vm2, %v1378_v50, %v1370_v18 }
 0x260   : > { %v3415_v58 = vmul.f32 %v3384_v42, %v1462_v52  ;;  %v3418_v59 = vmul.f32 %v3387_v44, %v1458_v51  ;;  %v3442_v18 = vmul.f32 %v3403_v53, %v1389_v62  ;;  %v3445_v34 = vmul.f32 %v3406_v54, %v1385_v61 }
 0x262   : > { %v1380_v14 = vpop.permute.xlu0 %1379  ;;  %v1306_v16 = vpop.permute.xlu1 %1305 }
 0x263   : > { %v1386_v19 = vsel %vm352_vm2, %v1372_v20, %v1380_v14  ;;  %v1390_v22 = vsel %vm352_vm2, %v1380_v14, %v1372_v20  ;;  %v2491_v20 = vld [vmem:[%s3761_s1 + $0xe] sm:$0x3]  ;;  %v1313_v38 = vsel %vm279_vm3, %v1298_v21, %v1306_v16  ;;  %v1317_v45 = vsel %vm279_vm3, %v1306_v16, %v1298_v21 }
 0x264   : > { %v3448_v35 = vmul.f32 %v3403_v53, %v1390_v22  ;;  %v3451_v37 = vmul.f32 %v3406_v54, %v1386_v19  ;;  %v3469_v60 = vrot.slane %v2491_v20, %v2946_v13  ;;  %v3472_v61 = vrot.slane %v2491_v20, %v2940_v12 }
 0x265   : > { %v3475_v21 = vmul.f32 %v3436_v23, %v1317_v45  ;;  %v3478_v62 = vmul.f32 %v3439_v28, %v1313_v38  ;;  %v1530_v22 = vsel %vm500_vm0, %v3325_v15, %v3371_v36 }
 0x266   : > { %v1308_v47 = vpop.permute.xlu0 %1307  ;;  %v1766_v49 = vpop.permute.xlu1 %1765 }
 0x267   : > { %v1314_v51 = vsel %vm279_vm3, %v1300_v24, %v1308_v47  ;;  %v1318_v52 = vsel %vm279_vm3, %v1308_v47, %v1300_v24  ;;  %v1773_v24 = vsel %vm750_vm4, %v3346_v25, %v1766_v49  ;;  %v1777_v19 = vsel %vm750_vm4, %v1766_v49, %v3346_v25 }
 0x268   : > { %v3481_v14 = vmul.f32 %v3436_v23, %v1318_v52  ;;  %v3484_v16 = vmul.f32 %v3439_v28, %v1314_v51  ;;  %v3503_v52 = vmul.f32 %v3469_v60, %v1773_v24  ;;  %v3506_v25 = vmul.f32 %v3472_v61, %v1777_v19 }
 0x26a   : > { %v1768_v20 = vpop.permute.xlu0 %1767  ;;  %v1518_v38 = vpop.permute.xlu1 %1517 }
 0x26b   : > { %v1774_v47 = vsel %vm750_vm4, %v3356_v30, %v1768_v20  ;;  %v1778_v51 = vsel %vm750_vm4, %v1768_v20, %v3356_v30  ;;  %v1546_v30 = vrot.slane %v3351_v27, %v2940_v12 }
 0x26c   : > { %v3509_v49 = vmul.f32 %v3469_v60, %v1774_v47  ;;  %v3512_v26 = vmul.f32 %v3472_v61, %v1778_v51 }
 0x26d   : > { %v1552_v6 = vmul.f32 %v1546_v30, %v1530_v22  ;;  %v1550_v7 = vmul.f32 %v1546_v30, %v1529_v1 }
 0x26e   : > { %v1520_v45 = vpop.permute.xlu0 %1519  ;;  %v1446_v46 = vpop.permute.xlu1 %1445 }
 0x26f   : > { %v2670_v11 = vpack.c.bf16 %v1552_v6, %v1550_v7 }
 0x272   : > { %v1448_v20 = vpop.permute.xlu0 %1447  ;;  %v1374_v24 = vpop.permute.xlu1 %1373 }
 0x276   : > { %v1376_v50 = vpop.permute.xlu0 %1375  ;;  %v3518_v8 = vpop.permute.xlu1 %1301 }
 0x27a   : > { %v3520_v19 = vpop.permute.xlu0 %1303  ;;  %v3522_v47 = vpop.permute.xlu1 %1761 }
 0x27e   : > { %v3524_v17 = vpop.permute.xlu0 %1763  ;;  %v1526_v51 = vpop.permute.xlu1 %1525 }
 0x27f   : > { %v1531_v48 = vsel %vm500_vm0, %v1518_v38, %v1526_v51  ;;  %v1535_v2 = vsel %vm500_vm0, %v1526_v51, %v1518_v38 }
 0x280   : > { %v1553_v36 = vmul.f32 %v3362_v33, %v1535_v2  ;;  %v1554_v4 = vmul.f32 %v1546_v30, %v1531_v48 }
 0x282   : > { %v1528_v3 = vpop.permute.xlu0 %1527  ;;  %v3536_v0 = vpop.permute.xlu1 %1689 }
 0x283   : > { %v1532_v15 = vsel %vm500_vm0, %v1520_v45, %v1528_v3  ;;  %v1536_v27 = vsel %vm500_vm0, %v1528_v3, %v1520_v45 }
 0x284   : > { %v1555_v38 = vmul.f32 %v3362_v33, %v1536_v27  ;;  %v1556_v51 = vmul.f32 %v1546_v30, %v1532_v15 }
 0x286   : > { %v2671_v32 = vpack.c.bf16 %v1555_v38, %v1553_v36  ;;  %v3548_v29 = vpop.permute.xlu0 %1691  ;;  %v1454_v43 = vpop.permute.xlu1 %1453  ;;  %v2672_v40 = vpack.c.bf16 %v1556_v51, %v1554_v4  ;;  %v3792_v51 = vpack.c.bf16 %v3415_v58, %v3409_v56 }
 0x287   : > { %v1459_v31 = vsel %vm426_vm1, %v1446_v46, %v1454_v43  ;;  %v1463_v3 = vsel %vm426_vm1, %v1454_v43, %v1446_v46 }
 0x288   : > { %2185 = vmatprep.subr.bf16.mxu1 %v2672_v40  ;;  %v1481_v4 = vmul.f32 %v3384_v42, %v1463_v3  ;;  %v1482_v6 = vmul.f32 %v3387_v44, %v1459_v31 }
 0x289   : > { %2186 = vmatpush1.bf16.msra.mxu1 %v2671_v32  ;;  %v3790_v32 = vpack.c.bf16 %v3381_v41, %v3378_v39 }
 0x28a   : > { %v1456_v2 = vpop.permute.xlu0 %1455  ;;  %2187 = vmatprep.subr.bf16.mxu1 %v2670_v11  ;;  %v1382_v48 = vpop.permute.xlu1 %1381 }
 0x28b   : > { %v1460_v1 = vsel %vm426_vm1, %v1448_v20, %v1456_v2  ;;  %v1464_v33 = vsel %vm426_vm1, %v1456_v2, %v1448_v20  ;;  %v1387_v30 = vsel %vm352_vm2, %v1374_v24, %v1382_v48  ;;  %v1391_v20 = vsel %vm352_vm2, %v1382_v48, %v1374_v24 }
 0x28c   : > { %v1483_v7 = vmul.f32 %v3384_v42, %v1464_v33  ;;  %v1484_v40 = vmul.f32 %v3387_v44, %v1460_v1  ;;  %v3791_v44 = vpack.c.bf16 %v3418_v59, %v3412_v57  ;;  %v1409_v27 = vmul.f32 %v3403_v53, %v1391_v20 }
 0x28d   : > { %2188 = vmatpush1.bf16.msra.mxu1 %v3790_v32  ;;  %v1410_v36 = vmul.f32 %v3406_v54, %v1387_v30 }
 0x28e   : > { %v2667_v43 = vpack.c.bf16 %v1483_v7, %v1481_v4  ;;  %v3565_v46 = vpop.permute.xlu0 %1687  ;;  %v1310_v22 = vpop.permute.xlu1 %1309  ;;  %v2668_v45 = vpack.c.bf16 %v1484_v40, %v1482_v6 }
 0x28f   : > { %v1319_v3 = vsel %vm279_vm3, %v1310_v22, %v3518_v8 }
 0x290   : > { %2189 = vmatprep.subr.bf16.mxu1 %v2668_v45  ;;  %v1337_v48 = vmul.f32 %v3436_v23, %v1319_v3  ;;  %v3796_v45 = vpack.c.bf16 %v3481_v14, %v3475_v21  ;;  %v2481_v14 = vld [vmem:[%s3761_s1 + $0xa] sm:$0x3] }
 0x291   : > { %2190 = vmatpush1.bf16.msra.mxu1 %v2667_v43  ;;  %v1646_v3 = vrot.slane %v2481_v14, %v2940_v12 }
 0x292   : > { %v1384_v42 = vpop.permute.xlu0 %1383  ;;  %2191 = vmatprep.subr.bf16.mxu1 %v3791_v44  ;;  %v1770_v39 = vpop.permute.xlu1 %1769 }
 0x293   : > { %v1388_v41 = vsel %vm352_vm2, %v1376_v50, %v1384_v42  ;;  %v1392_v15 = vsel %vm352_vm2, %v1384_v42, %v1376_v50  ;;  %v1315_v50 = vsel %vm279_vm3, %v3518_v8, %v1310_v22 }
 0x294   : > { %v1411_v38 = vmul.f32 %v3403_v53, %v1392_v15  ;;  %v1412_v24 = vmul.f32 %v3406_v54, %v1388_v41  ;;  %v3793_v54 = vpack.c.bf16 %v3451_v37, %v3445_v34  ;;  %v1338_v1 = vmul.f32 %v3439_v28, %v1315_v50 }
 0x295   : > { %2192 = vmatpush1.bf16.msra.mxu1 %v3792_v51  ;;  %v3794_v34 = vpack.c.bf16 %v3448_v35, %v3442_v18  ;;  %v3795_v18 = vpack.c.bf16 %v3484_v16, %v3478_v62 }
 0x296   : > { %v2663_v57 = vpack.c.bf16 %v1411_v38, %v1409_v27  ;;  %v1696_v59 = vpop.permute.xlu0 %1695  ;;  %v1698_v11 = vpop.permute.xlu1 %1697  ;;  %v2664_v31 = vpack.c.bf16 %v1412_v24, %v1410_v36  ;;  %v3797_v27 = vpack.c.bf16 %v3512_v26, %v3506_v25  ;;  %v1642_v25 = vrot.slane %v2481_v14, %v2946_v13 }
 0x297   : > { %v1703_v41 = vsel %vm676_vm5, %v3536_v0, %v1698_v11  ;;  %v1706_v21 = vsel %vm676_vm5, %v1696_v59, %v3565_v46  ;;  %v1702_v26 = vsel %vm676_vm5, %v3565_v46, %v1696_v59 }
 0x298   : > { %2193 = vmatprep.subr.bf16.mxu1 %v2664_v31 }
 0x299   : > { %2194 = vmatpush1.bf16.msra.mxu1 %v2663_v57 }
 0x29a   : > { %v1312_v53 = vpop.permute.xlu0 %1311  ;;  %2195 = vmatprep.subr.bf16.mxu1 %v3793_v54  ;;  %v1686_v56 = vpop.permute.xlu1 %1685 }
 0x29b   : > { %v1316_v58 = vsel %vm279_vm3, %v3520_v19, %v1312_v53  ;;  %v1320_v2 = vsel %vm279_vm3, %v1312_v53, %v3520_v19  ;;  %v1775_v19 = vsel %vm750_vm4, %v3522_v47, %v1770_v39  ;;  %v3798_v53 = vpack.c.bf16 %v3509_v49, %v3503_v52 }
 0x29c   : > { %v1339_v8 = vmul.f32 %v3436_v23, %v1320_v2  ;;  %v1340_v33 = vmul.f32 %v3439_v28, %v1316_v58  ;;  %v1779_v23 = vsel %vm750_vm4, %v1770_v39, %v3522_v47  ;;  %v1797_v43 = vmul.f32 %v3469_v60, %v1775_v19  ;;  %v2486_v47 = vld [vmem:[%s3761_s1 + $0xc] sm:$0x3] }
 0x29d   : > { %2196 = vmatpush1.bf16.msra.mxu1 %v3794_v34  ;;  %v1798_v22 = vmul.f32 %v3472_v61, %v1779_v23  ;;  %v1714_v44 = vrot.slane %v2486_v47, %v2946_v13  ;;  %v1718_v39 = vrot.slane %v2486_v47, %v2940_v12 }
 0x29e   : > { %v2659_v37 = vpack.c.bf16 %v1339_v8, %v1337_v48  ;;  %v3607_v4 = vpop.permute.xlu0 %1619  ;;  %v1694_v6 = vpop.permute.xlu1 %1693  ;;  %v2660_v7 = vpack.c.bf16 %v1340_v33, %v1338_v1 }
 0x29f   : > { %v1725_v38 = vmul.f32 %v1714_v44, %v1703_v41  ;;  %v1724_v54 = vmul.f32 %v1718_v39, %v1706_v21  ;;  %v1723_v59 = vmul.f32 %v1714_v44, %v1702_v26 }
 0x2a0   : > { %2197 = vmatprep.subr.bf16.mxu1 %v2660_v7 }
 0x2a1   : > { %2198 = vmatpush1.bf16.msra.mxu1 %v2659_v37 }
 0x2a2   : > { %v1772_v28 = vpop.permute.xlu0 %1771  ;;  %2199 = vmatprep.subr.bf16.mxu1 %v3795_v18  ;;  %v1618_v35 = vpop.permute.xlu1 %1617 }
 0x2a3   : > { %v1776_v40 = vsel %vm750_vm4, %v3524_v17, %v1772_v28  ;;  %v1780_v32 = vsel %vm750_vm4, %v1772_v28, %v3524_v17 }
 0x2a4   : > { %v1799_v62 = vmul.f32 %v3469_v60, %v1776_v40  ;;  %v1800_v16 = vmul.f32 %v3472_v61, %v1780_v32  ;;  %v1707_v60 = vsel %vm676_vm5, %v1698_v11, %v3536_v0  ;;  %v1705_v61 = vsel %vm676_vm5, %v1694_v6, %v1686_v56 }
 0x2a5   : > { %2200 = vmatpush1.bf16.msra.mxu1 %v3796_v45  ;;  %v1701_v0 = vsel %vm676_vm5, %v1686_v56, %v1694_v6  ;;  %v1726_v57 = vmul.f32 %v1718_v39, %v1707_v60  ;;  %v1722_v11 = vmul.f32 %v1718_v39, %v1705_v61  ;;  %v2676_v60 = vpack.c.bf16 %v3262_v9, %v3256_v63  ;;  %v3799_v63 = vld [vmem:[#allocation12_spill] sm:$0xff]  ;;  %v3800_v9 = vld [vmem:[#allocation13_spill] sm:$0xff] }
 0x2a6   : > { %v2687_v30 = vpack.c.bf16 %v1799_v62, %v1797_v43  ;;  %v1616_v20 = vpop.permute.xlu0 %1615  ;;  %v1626_v42 = vpop.permute.xlu1 %1625  ;;  %v2688_v17 = vpack.c.bf16 %v1800_v16, %v1798_v22  ;;  %v1721_v56 = vmul.f32 %v1714_v44, %v1701_v0 }
 0x2a7   : > { %v1631_v1 = vsel %vm602_vm6, %v1618_v35, %v1626_v42  ;;  %v1635_v46 = vsel %vm602_vm6, %v1626_v42, %v1618_v35  ;;  %v2682_v8 = vpack.c.bf16 %v1724_v54, %v1722_v11  ;;  %v2496_v42 = vld [vmem:[%s3761_s1 + $0x10] sm:$0x3] }
 0x2a8   : > { %2201 = vmatprep.subr.bf16.mxu1 %v2688_v17  ;;  %v2681_v49 = vpack.c.bf16 %v1723_v59, %v1721_v56  ;;  %v1653_v34 = vmul.f32 %v1642_v25, %v1631_v1  ;;  %v1654_v37 = vmul.f32 %v1646_v3, %v1635_v46  ;;  %v1862_v41 = vrot.slane %v2496_v42, %v2940_v12  ;;  %v2723_v46 = vld [vmem:[%s3764_s4 + $0x8] ss:$12 sps:$4 sm:$0xff]   ;;  %v2726_v59 = vld [vmem:[%s3764_s4 + $0x18] ss:$12 sps:$4 sm:$0xff]  }
 0x2a9   : > { %2202 = vmatpush2.bf16.msra.mxu1 %v2687_v30  ;;  %v2675_v12 = vpack.c.bf16 %v3236_v55, %v3230_v5 }
 0x2aa   : > { %v1700_v15 = vpop.permute.xlu0 %1699  ;;  %2203 = vmatprep.subr.bf16.mxu1 %v3797_v27  ;;  %v1614_v36 = vpop.permute.xlu1 %1613 }
 0x2ab   : > { %v1704_v24 = vsel %vm676_vm5, %v3548_v29, %v1700_v15  ;;  %v1708_v51 = vsel %vm676_vm5, %v1700_v15, %v3548_v29 }
 0x2ac   : > { %v1727_v31 = vmul.f32 %v1714_v44, %v1704_v24  ;;  %v1728_v50 = vmul.f32 %v1718_v39, %v1708_v51  ;;  %v1858_v39 = vrot.slane %v2496_v42, %v2946_v13 }
 0x2ad   : > { %2204 = vmatpush2.bf16.msra.mxu1 %v3798_v53 }
 0x2ae   : > { %v2683_v58 = vpack.c.bf16 %v1727_v31, %v1725_v38  ;;  %v1624_v29 = vpop.permute.xlu0 %1623  ;;  %v1622_v2 = vpop.permute.xlu1 %1621  ;;  %v2684_v48 = vpack.c.bf16 %v1728_v50, %v1726_v57 }
 0x2af   : > { %v1634_v33 = vsel %vm602_vm6, %v1624_v29, %v1616_v20  ;;  %v1633_v52 = vsel %vm602_vm6, %v1622_v2, %v1614_v36  ;;  %v1630_v19 = vsel %vm602_vm6, %v1616_v20, %v1624_v29  ;;  %v1629_v23 = vsel %vm602_vm6, %v1614_v36, %v1622_v2  ;;  %v2720_v2 = vld [vmem:[%s3764_s4] ss:$12 sps:$4 sm:$0xff]  }
 0x2b0   : > { %2205 = vmatprep.subr.bf16.mxu1 %v2684_v48  ;;  %v1652_v35 = vmul.f32 %v1646_v3, %v1634_v33  ;;  %v1650_v40 = vmul.f32 %v1646_v3, %v1633_v52  ;;  %v1651_v45 = vmul.f32 %v1642_v25, %v1630_v19  ;;  %v1649_v30 = vmul.f32 %v1642_v25, %v1629_v23  ;;  %v2724_v48 = vld [vmem:[%s3764_s4 + $0x1c] ss:$12 sps:$4 sm:$0xff]   ;;  %v2727_v33 = vld [vmem:[%s3764_s4 + $0x20] ss:$12 sps:$4 sm:$0xff]  }
 0x2b1   : > { %2206 = vmatpush2.bf16.msra.mxu1 %v2683_v58  ;;  %v2674_v36 = vpack.c.bf16 %v3800_v9, %v3799_v63 }
 0x2b2   : > { %v1628_v6 = vpop.permute.xlu0 %1627  ;;  %2207 = vmatprep.subr.bf16.mxu1 %v2682_v8  ;;  %v1834_v7 = vpop.permute.xlu1 %1833  ;;  %v2678_v20 = vpack.c.bf16 %v1652_v35, %v1650_v40  ;;  %v2677_v44 = vpack.c.bf16 %v1651_v45, %v1649_v30  ;;  %v3803_v8 = vmov 0   ;;  %v3804_v30 = vld [vmem:[#allocation9_spill] sm:$0xff] }
 0x2b3   : > { %v1632_v28 = vsel %vm602_vm6, %v3607_v4, %v1628_v6  ;;  %v1636_v18 = vsel %vm602_vm6, %v1628_v6, %v3607_v4 }
 0x2b4   : > { %v1655_v32 = vmul.f32 %v1642_v25, %v1632_v28  ;;  %v1656_v43 = vmul.f32 %v1646_v3, %v1636_v18  ;;  %v3801_v25 = vld [vmem:[#allocation10_spill] sm:$0xff]  ;;  %v3802_v3 = vld [vmem:[#allocation11_spill] sm:$0xff] }
 0x2b5   : > { %2208 = vmatpush2.bf16.msra.mxu1 %v2681_v49  ;;  %v2673_v53 = vpack.c.bf16 %v3802_v3, %v3801_v25  ;;  %v3810_v3 = vld [vmem:[#allocation5_spill] sm:$0xff] }
 0x2b6   : > { %v2679_v22 = vpack.c.bf16 %v1655_v32, %v1653_v34  ;;  %v1836_v47 = vpop.permute.xlu0 %1835  ;;  %v1842_v62 = vpop.permute.xlu1 %1841  ;;  %v2680_v16 = vpack.c.bf16 %v1656_v43, %v1654_v37  ;;  %v2728_v32 = vld [vmem:[%s2797_s26] sm:$0xff] }
 0x2b7   : > { %v1847_v61 = vsel %vm824_vm7, %v1834_v7, %v1842_v62  ;;  %v1851_v21 = vsel %vm824_vm7, %v1842_v62, %v1834_v7 }
 0x2b8   : > { %2209 = vmatprep.subr.bf16.mxu1 %v2680_v16  ;;  %v1869_v38 = vmul.f32 %v1858_v39, %v1847_v61  ;;  %v1870_v0 = vmul.f32 %v1862_v41, %v1851_v21 }
 0x2b9   : > { %2210 = vmatpush2.bf16.msra.mxu1 %v2679_v22 }
 0x2ba   : > { %v1832_v17 = vpop.permute.xlu0 %1831  ;;  %2211 = vmatprep.subr.bf16.mxu1 %v2678_v20  ;;  %v1830_v4 = vpop.permute.xlu1 %1829 }
 0x2bd   : > { %2212 = vmatpush2.bf16.msra.mxu1 %v2677_v44 }
 0x2be   : > { %v1844_v14 = vpop.permute.xlu0 %1843  ;;  %2213 = vmatprep.subr.bf16.mxu1 %v2676_v60  ;;  %v1838_v15 = vpop.permute.xlu1 %1837 }
 0x2bf   : > { %v1848_v27 = vsel %vm824_vm7, %v1836_v47, %v1844_v14  ;;  %v1852_v13 = vsel %vm824_vm7, %v1844_v14, %v1836_v47  ;;  %v1845_v57 = vsel %vm824_vm7, %v1830_v4, %v1838_v15  ;;  %v1849_v11 = vsel %vm824_vm7, %v1838_v15, %v1830_v4 }
 0x2c0   : > { %v1871_v24 = vmul.f32 %v1858_v39, %v1848_v27  ;;  %v1872_v51 = vmul.f32 %v1862_v41, %v1852_v13  ;;  %v1865_v54 = vmul.f32 %v1858_v39, %v1845_v57  ;;  %v1866_v56 = vmul.f32 %v1862_v41, %v1849_v11  ;;  %v3806_v27 = vld [vmem:[#allocation8_spill] sm:$0xff]  ;;  %v3808_v11 = vld [vmem:[#allocation3_spill] sm:$0xff] }
 0x2c1   : > { %2214 = vmatpush2.bf16.msra.mxu1 %v2675_v12 }
 0x2c2   : > { %v2691_v31 = vpack.c.bf16 %v1871_v24, %v1869_v38  ;;  %v1840_v50 = vpop.permute.xlu0 %1839  ;;  %2215 = vmatprep.subr.bf16.mxu1 %v2674_v36  ;;  %v2692_v26 = vpack.c.bf16 %v1872_v51, %v1870_v0  ;;  %v3807_v38 = vld [vmem:[#allocation4_spill] sm:$0xff] }
 0x2c3   : > { %v1846_v5 = vsel %vm824_vm7, %v1832_v17, %v1840_v50  ;;  %v1850_v55 = vsel %vm824_vm7, %v1840_v50, %v1832_v17 }
 0x2c4   : > { %v1867_v58 = vmul.f32 %v1858_v39, %v1846_v5  ;;  %v1868_v29 = vmul.f32 %v1862_v41, %v1850_v55  ;;  %2250 = vmatprep.subr.bf16.mxu0 %v2692_v26  ;;  %v3805_v39 = vld [vmem:[#allocation7_spill] sm:$0xff]  ;;  %v3809_v5 = vld [vmem:[#allocation6_spill] sm:$0xff] }
 0x2c5   : > { %2216 = vmatpush2.bf16.msra.mxu1 %v2673_v53  ;;  %2251 = vmatpush1.bf16.msra.mxu0 %v2691_v31 }
 0x2c6   : > { %v2689_v10 = vpack.c.bf16 %v1867_v58, %v1865_v54  ;;  %v2690_v1 = vpack.c.bf16 %v1868_v29, %v1866_v56 }
 0x2c8   : > { %2218 = vmatmul.mubr.bf16.vlgmr.msra.gmra.mxu1 %v2720_v2  ;;  %2252 = vmatprep.subr.bf16.mxu0 %v2690_v1 }
 0x2c9   : > { %2253 = vmatpush1.bf16.msra.mxu0 %v2689_v10  ;;  %2227 = vmatprep.mubr.bf16.mxu1 %v2724_v48 }
 0x2cb   : > { %v1952_v49 = vpop.permute.xlu1 %1951 }
 0x2cc   : > { %2543 = vmatmul.mubr.msk.bf16.vlgmr.msra.gmra.mxu0 %vm1160_vm8, %v2723_v46 }
 0x2cd   : > { %2280 = vmatprep.mubr.bf16.mxu0 %v3803_v8 }
 0x2cf   : > { %v1957_v19 = vpop.permute.xlu0 %1956  ;;  %v1962_v16 = vpop.permute.xlu1 %1961 }
 0x2d0   : > { %2228 = vmatmul.mubr.bf16.gmra.mxu1 %v2726_v59 }
 0x2d3   : > { %v1967_v14 = vpop.permute.xlu0 %1966 }
 0x2d4   : > { %2544 = vmatmul.mubr.msk.bf16.gmra.mxu0 %vm1160_vm8, %v2727_v33 }
 0x388   : > { %v2219_v52 = vpop.f32.mrf.mxu1 }
 0x389   : > { %v2220_v37 = vadd.f32 %v2219_v52, %v1952_v49 }
 0x38a   : > { %v2221_v34 = vpop.f32.mrf.mxu1 }
 0x38b   : > { %v2222_v23 = vadd.f32 %v2221_v34, %v1952_v49 }
 0x38c   : > { %v2223_v6 = vpop.f32.mrf.mxu1  ;;  %v2272_v7 = vpop.f32.mrf.mxu0 }
 0x38d   : > { %v2273_v28 = vadd.f32 %v2272_v7, %v2220_v37  ;;  %v2224_v40 = vadd.f32 %v2223_v6, %v1957_v19 }
 0x38e   : > { %v2225_v18 = vpop.f32.mrf.mxu1  ;;  %v2274_v35 = vpop.f32.mrf.mxu0 }
 0x38f   : > { %v2291_v43 = vadd.f32 %v2728_v32, %v2273_v28  ;;  %v2275_v22 = vadd.f32 %v2274_v35, %v2222_v23  ;;  %v2226_v45 = vadd.f32 %v2225_v18, %v1957_v19 }
 0x390   : > { %v2229_v47 = vpop.f32.mrf.mxu1  ;;  %v2276_v62 = vpop.f32.mrf.mxu0 }
 0x391   : > { %2299 = vst [vmem:[%s3739_s24] sm:$0xff] %v2291_v43  ;;  %v2292_v20 = vadd.f32 %v2275_v22, %v3804_v30  ;;  %v2277_v42 = vadd.f32 %v2276_v62, %v2224_v40  ;;  %v2230_v44 = vadd.f32 %v2229_v47, %v1962_v16 }
 0x392   : > { %v2231_v17 = vpop.f32.mrf.mxu1  ;;  %v2278_v4 = vpop.f32.mrf.mxu0 }
 0x393   : > { %2300 = vst [vmem:[%s3739_s24 + $0x8] sm:$0xff] %v2292_v20  ;;  %v2293_v41 = vadd.f32 %v2277_v42, %v3805_v39  ;;  %v2279_v60 = vadd.f32 %v2278_v4, %v2226_v45  ;;  %v2232_v15 = vadd.f32 %v2231_v17, %v1962_v16 }
 0x394   : > { %v2233_v61 = vpop.f32.mrf.mxu1  ;;  %v2282_v21 = vpop.f32.mrf.mxu0 }
 0x395   : > { %2301 = vst [vmem:[%s3739_s24 + $0x10] sm:$0xff] %v2293_v41  ;;  %v2294_v13 = vadd.f32 %v2279_v60, %v3806_v27  ;;  %v2283_v12 = vadd.f32 %v2282_v21, %v2230_v44  ;;  %v2234_v36 = vadd.f32 %v2233_v61, %v1967_v14 }
 0x396   : > { %v2235_v63 = vpop.f32.mrf.mxu1  ;;  %v2284_v9 = vpop.f32.mrf.mxu0 }
 0x397   : > { %2302 = vst [vmem:[%s3739_s24 + $0x18] sm:$0xff] %v2294_v13  ;;  %v2295_v0 = vadd.f32 %v2283_v12, %v3807_v38  ;;  %v2285_v24 = vadd.f32 %v2284_v9, %v2232_v15  ;;  %v2236_v57 = vadd.f32 %v2235_v63, %v1967_v14 }
 0x398   : > { %v2286_v51 = vpop.f32.mrf.mxu0 }
 0x399   : > { %2303 = vst [vmem:[%s3739_s24 + $0x20] sm:$0xff] %v2295_v0  ;;  %v2296_v31 = vadd.f32 %v2285_v24, %v3808_v11  ;;  %v2287_v50 = vadd.f32 %v2286_v51, %v2234_v36 }
 0x39a   : > { %v2288_v26 = vpop.f32.mrf.mxu0 }
 0x39b   : > { %2304 = vst [vmem:[%s3739_s24 + $0x28] sm:$0xff] %v2296_v31  ;;  %v2297_v55 = vadd.f32 %v2287_v50, %v3809_v5  ;;  %v2289_v25 = vadd.f32 %v2288_v26, %v2236_v57 }
 0x39d   : > { %2305 = vst [vmem:[%s3739_s24 + $0x30] sm:$0xff] %v2297_v55  ;;  %v2298_v53 = vadd.f32 %v2289_v25, %v3810_v3 }
 0x39f   : > { %2306 = vst [vmem:[%s3739_s24 + $0x38] sm:$0xff] %v2298_v53 }
 0x3a0 PF: > { %s16_s21 = sadd.s32 1, %s2735_s21  }
 0x3a1   : > { %p13_p4 = scmp.ge.s32.totalorder %s16_s21, 4  }
 0x3a3   :  { %15 = sbr.rel (!%p13_p4) target bundleno = 1 (0x1), region = 81 }

</bundles_post_ra>
